<compile_context>
chip_gen: v6e
topology: v6e:2x2x1
jax: 0.10.0
libtpu: 0.0.40
codegen_flags: <defaults>
</compile_context>

<pallas_src>
import functools

import jax
import jax.numpy as jnp
from jax.experimental import pallas as pl
from jax.experimental.pallas import tpu as pltpu


# ---------------------------------------------------------------------------
# Fused kernel: backbone stand-in + CustomHead, one grid step per batch tile.
# ---------------------------------------------------------------------------
def _fused_kernel(hw, x_ref, wb_ref, bb_ref, w1_ref, s1_ref, b1_ref,
                  w2_ref, s2_ref, b2_ref, out_ref):
    # x_ref:  [TB*HW, CP]  pixels, channels zero-padded to CP=4 (f32)
    # wb_ref: [CP, F]      1x1-conv weight (zero rows for padded channels)
    # bb_ref: [1, F]       conv bias (f32)
    # w1_ref: [F, 1024]    int8   s1_ref: [1, 1024] f32   b1_ref: [1, 1024] f32
    # w2_ref: [1024, CLSP] int8   s2_ref: [1, CLSP] f32   b2_ref: [1, CLSP] f32
    # out_ref:[TB, CLSP]   f32    (CLSP = 128, lane-dense)
    tb_hw, _ = x_ref.shape
    tb = tb_hw // hw
    f = wb_ref.shape[1]

    # --- backbone stand-in: 1x1 conv -> bias -> ReLU -> global average pool ---
    h = jnp.dot(x_ref[...], wb_ref[...],
                preferred_element_type=jnp.float32)            # [TB*HW, F] (MXU)
    h = jnp.maximum(h + bb_ref[...], 0.0)                      # bias + ReLU (VPU)
    # Mean pool as a sublane reduction over HW (XLU/VPU) -- no dense pool matmul.
    feats = h.reshape(tb, hw, f).sum(axis=1) * (1.0 / hw)      # [TB, F]

    # --- head: Linear(F,1024) -> Dropout(identity @ eval) -> ReLU -> Linear ---
    # int8 weights widened to bf16 in-kernel (exact: |q| <= 127) so the MXU path
    # is bf16 on every generation; dequant multiplies the f32 accumulator.
    w1 = w1_ref[...].astype(jnp.float32).astype(jnp.bfloat16)
    h1 = jnp.dot(feats.astype(jnp.bfloat16), w1,
                 preferred_element_type=jnp.float32)           # [TB, 1024]
    h1 = jnp.maximum(h1 * s1_ref[...] + b1_ref[...], 0.0)

    w2 = w2_ref[...].astype(jnp.float32).astype(jnp.bfloat16)
    logits = jnp.dot(h1.astype(jnp.bfloat16), w2,
                     preferred_element_type=jnp.float32)       # [TB, CLSP]
    out_ref[...] = (logits * s2_ref[...] + b2_ref[...]).astype(out_ref.dtype)


# ---------------------------------------------------------------------------
# Wrapper: layout glue (fused under jit) + single fused pallas_call.
# ---------------------------------------------------------------------------
@jax.jit
def custom_resnet_forward(x_nchw, params):
    B, C, H, W = x_nchw.shape
    HW = H * W
    F = params["wb"].shape[1]
    HIDDEN = params["w1q"].shape[1]
    CLS = params["b2"].shape[1]

    # ---- layout glue (fuses with the custom call under jit) ----
    CP = 4                                               # pad RGB channels 3 -> 4
    x2d = jnp.transpose(x_nchw, (0, 2, 3, 1)).reshape(B * HW, C)
    x2d = jnp.pad(x2d, ((0, 0), (0, CP - C)))
    wbp = jnp.pad(params["wb"], ((0, CP - C), (0, 0)))

    CLSP = ((CLS + 127) // 128) * 128                    # lane-dense class dim
    w2p = jnp.pad(params["w2q"], ((0, 0), (0, CLSP - CLS)))
    s2p = jnp.pad(params["s2"], ((0, 0), (0, CLSP - CLS)))
    b2p = jnp.pad(params["b2"], ((0, 0), (0, CLSP - CLS)))

    # ---- batch tiling ----
    # TB <= 32 keeps the lane-padded x block (TB*HW rows x 128 lanes f32) small
    # enough for v7x's 64 MiB VMEM; TB is a multiple of 8 (or == B) so the
    # (TB, CLSP) out block stays legal; for B >= 16 the grid has >= 2 steps so
    # the "parallel" batch axis can shard across both v7x TensorCores.
    if B >= 16 and B % 8 == 0:
        TB = max(t for t in (8, 16, 32) if B % t == 0 and B // t >= 2)
    else:
        TB = B
    nb = B // TB

    cost = pl.CostEstimate(
        flops=(2 * B * HW * CP * F          # 1x1 conv (MXU)
               + B * HW * F                 # mean-pool adds (VPU/XLU)
               + 2 * B * F * HIDDEN         # head linear 1
               + 2 * B * HIDDEN * CLSP),    # head linear 2
        transcendentals=0,
        bytes_accessed=(x2d.size * 4 + wbp.size * 4 + params["bb"].size * 4
                        + params["w1q"].size * 1 + params["s1"].size * 4
                        + params["b1"].size * 4
                        + w2p.size * 1 + s2p.size * 4 + b2p.size * 4
                        + B * CLSP * 4),
    )

    out_padded = pl.pallas_call(
        functools.partial(_fused_kernel, HW),
        grid=(nb,),
        in_specs=[
            pl.BlockSpec((TB * HW, CP), lambda i: (i, 0)),    # x (per batch tile)
            pl.BlockSpec((CP, F), lambda i: (0, 0)),          # conv weight
            pl.BlockSpec((1, F), lambda i: (0, 0)),           # conv bias
            pl.BlockSpec((F, HIDDEN), lambda i: (0, 0)),      # w1 (int8)
            pl.BlockSpec((1, HIDDEN), lambda i: (0, 0)),      # s1 (f32 scales)
            pl.BlockSpec((1, HIDDEN), lambda i: (0, 0)),      # b1
            pl.BlockSpec((HIDDEN, CLSP), lambda i: (0, 0)),   # w2 (int8, padded)
            pl.BlockSpec((1, CLSP), lambda i: (0, 0)),        # s2 (padded)
            pl.BlockSpec((1, CLSP), lambda i: (0, 0)),        # b2 (padded)
        ],
        out_specs=pl.BlockSpec((TB, CLSP), lambda i: (i, 0)),
        out_shape=jax.ShapeDtypeStruct((B, CLSP), jnp.float32),
        compiler_params=pltpu.CompilerParams(
            dimension_semantics=("parallel",),    # megacore-shard batch tiles
            # Worst case TB=32: ~4 MiB x2 lane-padded x buffers + ~4 MiB conv
            # intermediate + <1 MiB int8 weights/biases -> 48 MiB leaves ample
            # headroom and still fits v7x's 64 MiB physical VMEM.
            vmem_limit_bytes=48 * 1024 * 1024,
        ),
        cost_estimate=cost,
    )(x2d, wbp, params["bb"], params["w1q"], params["s1"], params["b1"],
      w2p, s2p, b2p)

    return out_padded[:, :CLS]


# ---------------------------------------------------------------------------
# Deterministic parameter init (with int8 head-weight quantization) + run
# ---------------------------------------------------------------------------
def _quantize_per_out_channel(w):
    """f32 [in, out] -> (int8 [in, out], f32 [1, out]) with w ~= q * scale."""
    amax = jnp.max(jnp.abs(w), axis=0, keepdims=True)
    scale = jnp.maximum(amax, 1e-8) / 127.0
    q = jnp.clip(jnp.round(w / scale), -127.0, 127.0).astype(jnp.int8)
    return q, scale.astype(jnp.float32)


if __name__ == "__main__":
    B, C, H, W = 2, 3, 16, 16          # small NCHW image batch
    IN_FEATURES = 128                  # base_model.fc.in_features (synthetic)
    HIDDEN = 1024                      # CustomHead hidden width
    NUM_CLASSES = 100                  # CustomHead output classes

    key = jax.random.PRNGKey(0)
    kx, kwb, kbb, kw1, kb1, kw2, kb2 = jax.random.split(key, 7)

    x = jax.random.normal(kx, (B, C, H, W), dtype=jnp.float32)

    # Linear weights stored as [in, out] (equivalent to PyTorch's x @ W.T + b),
    # quantized to int8 + per-output-channel f32 scales (halves weight DMA).
    w1_f32 = 0.02 * jax.random.normal(kw1, (IN_FEATURES, HIDDEN), jnp.float32)
    w2_f32 = 0.02 * jax.random.normal(kw2, (HIDDEN, NUM_CLASSES), jnp.float32)
    w1q, s1 = _quantize_per_out_channel(w1_f32)
    w2q, s2 = _quantize_per_out_channel(w2_f32)

    params = {
        "wb": 0.1 * jax.random.normal(kwb, (C, IN_FEATURES), jnp.float32),
        "bb": 0.1 * jax.random.normal(kbb, (1, IN_FEATURES), jnp.float32),
        "w1q": w1q, "s1": s1,
        "b1": 0.01 * jax.random.normal(kb1, (1, HIDDEN), jnp.float32),
        "w2q": w2q, "s2": s2,
        "b2": 0.01 * jax.random.normal(kb2, (1, NUM_CLASSES), jnp.float32),
    }

    out = custom_resnet_forward(x, params)
    out = jax.block_until_ready(out)
    assert out.shape == (B, NUM_CLASSES), out.shape
    assert out.dtype == jnp.float32
    assert bool(jnp.all(jnp.isfinite(out)))
    print("KERNEL_OK")
</pallas_src>

<mosaic_0001>
module attributes {stable_mosaic.version = 11 : i64} {
  func.func @_fused_kernel(%arg0: i32, %arg1: memref<512x4xf32, #tpu.memory_space<vmem>>, %arg2: memref<4x128xf32, #tpu.memory_space<vmem>>, %arg3: memref<1x128xf32, #tpu.memory_space<vmem>>, %arg4: memref<128x1024xi8, #tpu.memory_space<vmem>>, %arg5: memref<1x1024xf32, #tpu.memory_space<vmem>>, %arg6: memref<1x1024xf32, #tpu.memory_space<vmem>>, %arg7: memref<1024x128xi8, #tpu.memory_space<vmem>>, %arg8: memref<1x128xf32, #tpu.memory_space<vmem>>, %arg9: memref<1x128xf32, #tpu.memory_space<vmem>>, %arg10: memref<2x128xf32, #tpu.memory_space<vmem>>) attributes {dimension_semantics = [#tpu.dimension_semantics<parallel>], iteration_bounds = array<i64: 1>, scalar_prefetch = 0 : i64, scratch_operands = 0 : i64, tpu.core_type = #tpu.core_type<tc>, window_params = [{transform_indices = @transform_0, window_bounds = array<i64: 512, 4>}, {pipeline_mode = #tpu.pipeline_mode<synchronous>, transform_indices = @transform_1, window_bounds = array<i64: 4, 128>}, {pipeline_mode = #tpu.pipeline_mode<synchronous>, transform_indices = @transform_2, window_bounds = array<i64: 1, 128>}, {pipeline_mode = #tpu.pipeline_mode<synchronous>, transform_indices = @transform_3, window_bounds = array<i64: 128, 1024>}, {pipeline_mode = #tpu.pipeline_mode<synchronous>, transform_indices = @transform_4, window_bounds = array<i64: 1, 1024>}, {pipeline_mode = #tpu.pipeline_mode<synchronous>, transform_indices = @transform_5, window_bounds = array<i64: 1, 1024>}, {pipeline_mode = #tpu.pipeline_mode<synchronous>, transform_indices = @transform_6, window_bounds = array<i64: 1024, 128>}, {pipeline_mode = #tpu.pipeline_mode<synchronous>, transform_indices = @transform_7, window_bounds = array<i64: 1, 128>}, {pipeline_mode = #tpu.pipeline_mode<synchronous>, transform_indices = @transform_8, window_bounds = array<i64: 1, 128>}, {transform_indices = @transform_9, window_bounds = array<i64: 2, 128>}]} {
    %c0 = arith.constant 0 : index
    %c0_0 = arith.constant 0 : index
    %0 = vector.load %arg1[%c0, %c0_0] : memref<512x4xf32, #tpu.memory_space<vmem>>, vector<512x4xf32>
    %c0_1 = arith.constant 0 : index
    %c0_2 = arith.constant 0 : index
    %1 = vector.load %arg2[%c0_1, %c0_2] : memref<4x128xf32, #tpu.memory_space<vmem>>, vector<4x128xf32>
    %cst = arith.constant dense<0.000000e+00> : vector<512x128xf32>
    %2 = tpu.matmul %0, %1, %cst {dimension_numbers = #tpu.dot_dimension_numbers<[1], [0], [0], [1], [0, 0, 1, 1], [], []>} : vector<512x4xf32>, vector<4x128xf32>, vector<512x128xf32> -> vector<512x128xf32>
    %c0_3 = arith.constant 0 : index
    %c0_4 = arith.constant 0 : index
    %3 = vector.load %arg3[%c0_3, %c0_4] : memref<1x128xf32, #tpu.memory_space<vmem>>, vector<1x128xf32>
    %4 = vector.broadcast %3 : vector<1x128xf32> to vector<512x128xf32>
    %5 = arith.addf %2, %4 : vector<512x128xf32>
    %cst_5 = arith.constant 0.000000e+00 : f32
    %6 = vector.broadcast %cst_5 : f32 to vector<512x128xf32>
    %7 = arith.maximumf %5, %6 : vector<512x128xf32>
    %8 = vector.shape_cast %7 : vector<512x128xf32> to vector<2x256x128xf32>
    %cst_6 = arith.constant dense<0.000000e+00> : vector<2x128xf32>
    %9 = vector.multi_reduction <add>, %8, %cst_6 [1] : vector<2x256x128xf32> to vector<2x128xf32>
    %cst_7 = arith.constant 3.906250e-03 : f32
    %10 = vector.broadcast %cst_7 : f32 to vector<2x128xf32>
    %11 = arith.mulf %9, %10 : vector<2x128xf32>
    %c0_8 = arith.constant 0 : index
    %c0_9 = arith.constant 0 : index
    %12 = vector.load %arg4[%c0_8, %c0_9] : memref<128x1024xi8, #tpu.memory_space<vmem>>, vector<128x1024xi8>
    %13 = arith.sitofp %12 : vector<128x1024xi8> to vector<128x1024xf32>
    %14 = arith.truncf %13 : vector<128x1024xf32> to vector<128x1024xbf16>
    %15 = arith.truncf %11 : vector<2x128xf32> to vector<2x128xbf16>
    %cst_10 = arith.constant dense<0.000000e+00> : vector<2x1024xf32>
    %16 = tpu.matmul %15, %14, %cst_10 {dimension_numbers = #tpu.dot_dimension_numbers<[1], [0], [0], [1], [0, 0, 1, 1], [], []>} : vector<2x128xbf16>, vector<128x1024xbf16>, vector<2x1024xf32> -> vector<2x1024xf32>
    %c0_11 = arith.constant 0 : index
    %c0_12 = arith.constant 0 : index
    %17 = vector.load %arg5[%c0_11, %c0_12] : memref<1x1024xf32, #tpu.memory_space<vmem>>, vector<1x1024xf32>
    %18 = vector.broadcast %17 : vector<1x1024xf32> to vector<2x1024xf32>
    %19 = arith.mulf %16, %18 : vector<2x1024xf32>
    %c0_13 = arith.constant 0 : index
    %c0_14 = arith.constant 0 : index
    %20 = vector.load %arg6[%c0_13, %c0_14] : memref<1x1024xf32, #tpu.memory_space<vmem>>, vector<1x1024xf32>
    %21 = vector.broadcast %20 : vector<1x1024xf32> to vector<2x1024xf32>
    %22 = arith.addf %19, %21 : vector<2x1024xf32>
    %cst_15 = arith.constant 0.000000e+00 : f32
    %23 = vector.broadcast %cst_15 : f32 to vector<2x1024xf32>
    %24 = arith.maximumf %22, %23 : vector<2x1024xf32>
    %c0_16 = arith.constant 0 : index
    %c0_17 = arith.constant 0 : index
    %25 = vector.load %arg7[%c0_16, %c0_17] : memref<1024x128xi8, #tpu.memory_space<vmem>>, vector<1024x128xi8>
    %26 = arith.sitofp %25 : vector<1024x128xi8> to vector<1024x128xf32>
    %27 = arith.truncf %26 : vector<1024x128xf32> to vector<1024x128xbf16>
    %28 = arith.truncf %24 : vector<2x1024xf32> to vector<2x1024xbf16>
    %cst_18 = arith.constant dense<0.000000e+00> : vector<2x128xf32>
    %29 = tpu.matmul %28, %27, %cst_18 {dimension_numbers = #tpu.dot_dimension_numbers<[1], [0], [0], [1], [0, 0, 1, 1], [], []>} : vector<2x1024xbf16>, vector<1024x128xbf16>, vector<2x128xf32> -> vector<2x128xf32>
    %c0_19 = arith.constant 0 : index
    %c0_20 = arith.constant 0 : index
    %30 = vector.load %arg8[%c0_19, %c0_20] : memref<1x128xf32, #tpu.memory_space<vmem>>, vector<1x128xf32>
    %31 = vector.broadcast %30 : vector<1x128xf32> to vector<2x128xf32>
    %32 = arith.mulf %29, %31 : vector<2x128xf32>
    %c0_21 = arith.constant 0 : index
    %c0_22 = arith.constant 0 : index
    %33 = vector.load %arg9[%c0_21, %c0_22] : memref<1x128xf32, #tpu.memory_space<vmem>>, vector<1x128xf32>
    %34 = vector.broadcast %33 : vector<1x128xf32> to vector<2x128xf32>
    %35 = arith.addf %32, %34 : vector<2x128xf32>
    %c0_23 = arith.constant 0 : index
    %c0_24 = arith.constant 0 : index
    %36 = vector.load %arg10[%c0_23, %c0_24] : memref<2x128xf32, #tpu.memory_space<vmem>>, vector<2x128xf32>
    tpu.vector_store %arg10[%c0_23, %c0_24], %35 {strides = array<i32>} : memref<2x128xf32, #tpu.memory_space<vmem>>, vector<2x128xf32>,
    return
  }
  func.func @transform_0(%arg0: i32) -> (i32, i32) {
    %c0_i32 = arith.constant 0 : i32
    %c0_i32_0 = arith.constant 0 : i32
    return %arg0, %c0_i32 : i32, i32
  }
  func.func @transform_1(%arg0: i32) -> (i32, i32) {
    %c0_i32 = arith.constant 0 : i32
    %c0_i32_0 = arith.constant 0 : i32
    %c0_i32_1 = arith.constant 0 : i32
    return %c0_i32, %c0_i32_0 : i32, i32
  }
  func.func @transform_2(%arg0: i32) -> (i32, i32) {
    %c0_i32 = arith.constant 0 : i32
    %c0_i32_0 = arith.constant 0 : i32
    %c0_i32_1 = arith.constant 0 : i32
    return %c0_i32, %c0_i32_0 : i32, i32
  }
  func.func @transform_3(%arg0: i32) -> (i32, i32) {
    %c0_i32 = arith.constant 0 : i32
    %c0_i32_0 = arith.constant 0 : i32
    %c0_i32_1 = arith.constant 0 : i32
    return %c0_i32, %c0_i32_0 : i32, i32
  }
  func.func @transform_4(%arg0: i32) -> (i32, i32) {
    %c0_i32 = arith.constant 0 : i32
    %c0_i32_0 = arith.constant 0 : i32
    %c0_i32_1 = arith.constant 0 : i32
    return %c0_i32, %c0_i32_0 : i32, i32
  }
  func.func @transform_5(%arg0: i32) -> (i32, i32) {
    %c0_i32 = arith.constant 0 : i32
    %c0_i32_0 = arith.constant 0 : i32
    %c0_i32_1 = arith.constant 0 : i32
    return %c0_i32, %c0_i32_0 : i32, i32
  }
  func.func @transform_6(%arg0: i32) -> (i32, i32) {
    %c0_i32 = arith.constant 0 : i32
    %c0_i32_0 = arith.constant 0 : i32
    %c0_i32_1 = arith.constant 0 : i32
    return %c0_i32, %c0_i32_0 : i32, i32
  }
  func.func @transform_7(%arg0: i32) -> (i32, i32) {
    %c0_i32 = arith.constant 0 : i32
    %c0_i32_0 = arith.constant 0 : i32
    %c0_i32_1 = arith.constant 0 : i32
    return %c0_i32, %c0_i32_0 : i32, i32
  }
  func.func @transform_8(%arg0: i32) -> (i32, i32) {
    %c0_i32 = arith.constant 0 : i32
    %c0_i32_0 = arith.constant 0 : i32
    %c0_i32_1 = arith.constant 0 : i32
    return %c0_i32, %c0_i32_0 : i32, i32
  }
  func.func @transform_9(%arg0: i32) -> (i32, i32) {
    %c0_i32 = arith.constant 0 : i32
    %c0_i32_0 = arith.constant 0 : i32
    return %arg0, %c0_i32 : i32, i32
  }
}

</mosaic_0001>

<bundles_post_ra>
// kernel: custom_resnet_forward.1
= control target key start
LH: loop header
LB: loop body
LE: loop exit
PB: predicated region body
PF: predicated region fallthrough
CT: control target
= control target key end

     0   :  { %vm299_vm0 = vcmask 1043456   ;;  %vm106_vm1 = vcmask 31744   ;;  %s2491_s0 = inlined_call_operand.vmem [shape: f32[512,4], index: 0, kind: input, shape index: {}]   ;;  %s2492_s1 = inlined_call_operand.vmem [shape: f32[4,128], index: 1, kind: input, shape index: {}]   ;;  %s2493_s2 = inlined_call_operand.vmem [shape: f32[1,128], index: 2, kind: input, shape index: {}]   ;;  %s2494_s3 = inlined_call_operand.vmem [shape: s8[128,1024], index: 3, kind: input, shape index: {}]   ;;  %s2495_s4 = inlined_call_operand.vmem [shape: f32[1,1024], index: 4, kind: input, shape index: {}]   ;;  %s2496_s5 = inlined_call_operand.vmem [shape: f32[1,1024], index: 5, kind: input, shape index: {}]   ;;  %s2497_s6 = inlined_call_operand.vmem [shape: s8[1024,128], index: 6, kind: input, shape index: {}]   ;;  %s2498_s7 = inlined_call_operand.vmem [shape: f32[1,128], index: 7, kind: input, shape index: {}]   ;;  %s2499_s8 = inlined_call_operand.vmem [shape: f32[1,128], index: 8, kind: input, shape index: {}]   ;;  %s2500_s9 = inlined_call_operand.hbm [shape: f32[2,128], index: 9, kind: output, shape index: {}]  }
   0x1   :  { %v98_v0 = vld [vmem:[%s2492_s1] sm:$0xf]  ;;  %v35_v2 = vld [vmem:[%s2491_s0 + $0x8] sm:$0xff]  ;;  %v36_v3 = vld [vmem:[%s2491_s0 + $0x10] sm:$0xff] }
   0x2   :  { %v34_v1 = vld [vmem:[%s2491_s0] sm:$0xff]  ;;  %1722 = vmatprep.subr.msk.mxu0 %vm299_vm0, %v98_v0  ;;  %v37_v4 = vld [vmem:[%s2491_s0 + $0x18] sm:$0xff]  ;;  %v39_v6 = vld [vmem:[%s2491_s0 + $0x28] sm:$0xff] }
   0x3   :  { %1724 = vmatprep.mubr.msk.f32.mxu0 %vm106_vm1, %v34_v1  ;;  %1723 = vmatpush3.msk.msra.mxu0 %vm299_vm0, %v98_v0  ;;  %v38_v5 = vld [vmem:[%s2491_s0 + $0x20] sm:$0xff]  ;;  %v40_v7 = vld [vmem:[%s2491_s0 + $0x30] sm:$0xff]  ;;  %v41_v8 = vld [vmem:[%s2491_s0 + $0x38] sm:$0xff] }
   0x4   :  { %1725 = vmatmul.mubr.msk.f32.vlgmr.msra.gmra.mxu0 %vm106_vm1, %v35_v2  ;;  %v42_v9 = vld [vmem:[%s2491_s0 + $0x40] sm:$0xff]  ;;  %v43_v10 = vld [vmem:[%s2491_s0 + $0x48] sm:$0xff]  ;;  %v44_v11 = vld [vmem:[%s2491_s0 + $0x50] sm:$0xff] }
   0x5   :  { %1727 = vmatprep.mubr.msk.f32.mxu0 %vm106_vm1, %v36_v3  ;;  %v45_v12 = vld [vmem:[%s2491_s0 + $0x58] sm:$0xff]  ;;  %v46_v13 = vld [vmem:[%s2491_s0 + $0x60] sm:$0xff] }
   0x8   :  { %1728 = vmatmul.mubr.msk.f32.gmra.mxu0 %vm106_vm1, %v37_v4 }
   0x9   :  { %1730 = vmatprep.mubr.msk.f32.mxu0 %vm106_vm1, %v38_v5 }
   0xc   :  { %1731 = vmatmul.mubr.msk.f32.gmra.mxu0 %vm106_vm1, %v39_v6 }
   0xd   :  { %1733 = vmatprep.mubr.msk.f32.mxu0 %vm106_vm1, %v40_v7 }
  0x10   :  { %1734 = vmatmul.mubr.msk.f32.gmra.mxu0 %vm106_vm1, %v41_v8 }
  0x11   :  { %1736 = vmatprep.mubr.msk.f32.mxu0 %vm106_vm1, %v42_v9 }
  0x14   :  { %1737 = vmatmul.mubr.msk.f32.gmra.mxu0 %vm106_vm1, %v43_v10 }
  0x15   :  { %1739 = vmatprep.mubr.msk.f32.mxu0 %vm106_vm1, %v44_v11 }
  0x16   :  { %14 = vsyncpa [#allocation3], 0  ;;  %v47_v14 = vld [vmem:[%s2491_s0 + $0x68] sm:$0xff]  ;;  %v48_v15 = vld [vmem:[%s2491_s0 + $0x70] sm:$0xff]  ;;  %vm930_vm2 = vcmask 1041409   ;;  %s1845_s16 = smov [#allocation2]  }
  0x17   :  { %v49_v16 = vld [vmem:[%s2491_s0 + $0x78] sm:$0xff]  ;;  %v50_v17 = vld [vmem:[%s2491_s0 + $0x80] sm:$0xff]  ;;  %v51_v18 = vld [vmem:[%s2491_s0 + $0x88] sm:$0xff]  ;;  %s1493_s1 = sshll.u32 %s1845_s16, 4  ;;  %s1494_s1 = int_to_ptr.vmem [resolvable:$true] %s1493_s1 }
  0x18   :  { %1740 = vmatmul.mubr.msk.f32.gmra.mxu0 %vm106_vm1, %v45_v12  ;;  %v52_v19 = vld [vmem:[%s2491_s0 + $0x90] sm:$0xff]  ;;  %v53_v20 = vld [vmem:[%s2491_s0 + $0x98] sm:$0xff]  ;;  %v54_v21 = vld [vmem:[%s2491_s0 + $0xa0] sm:$0xff]  ;;  %s1822_s17 = scalar_lea.vmem %s1494_s1, 32  ;;  %p1827_p1 = scmp.lt.s32.totalorder %s1494_s1, %s1494_s1 }
  0x19   :  { %1742 = vmatprep.mubr.msk.f32.mxu0 %vm106_vm1, %v46_v13  ;;  %v55_v22 = vld [vmem:[%s2491_s0 + $0xa8] sm:$0xff]  ;;  %v56_v23 = vld [vmem:[%s2491_s0 + $0xb0] sm:$0xff]  ;;  %v57_v24 = vld [vmem:[%s2491_s0 + $0xb8] sm:$0xff]  ;;  %p1823_p0 = scmp.ne.s32.totalorder %s1494_s1, %s1822_s17  ;;  %p1828_p2 = scmp.lt.s32.totalorder %s1822_s17, %s1822_s17 }
  0x1a   :  { %v58_v25 = vld [vmem:[%s2491_s0 + $0xc0] sm:$0xff]  ;;  %v59_v26 = vld [vmem:[%s2491_s0 + $0xc8] sm:$0xff]  ;;  %v60_v27 = vld [vmem:[%s2491_s0 + $0xd0] sm:$0xff] }
  0x1b   :  { %v61_v28 = vld [vmem:[%s2491_s0 + $0xd8] sm:$0xff]  ;;  %v62_v29 = vld [vmem:[%s2491_s0 + $0xe0] sm:$0xff]  ;;  %v63_v30 = vld [vmem:[%s2491_s0 + $0xe8] sm:$0xff]  ;;  %p1829_p3 = por %p1828_p2, %p1827_p1 }
  0x1c   :  { %1743 = vmatmul.mubr.msk.f32.gmra.mxu0 %vm106_vm1, %v47_v14  ;;  %v64_v31 = vld [vmem:[%s2491_s0 + $0xf0] sm:$0xff]  ;;  %v65_v32 = vld [vmem:[%s2491_s0 + $0xf8] sm:$0xff]  ;;  %v66_v33 = vld [vmem:[%s2491_s0 + $0x100] sm:$0xff] }
  0x1d   :  { %1745 = vmatprep.mubr.msk.f32.mxu0 %vm106_vm1, %v48_v15  ;;  %v67_v34 = vld [vmem:[%s2491_s0 + $0x108] sm:$0xff]  ;;  %v68_v35 = vld [vmem:[%s2491_s0 + $0x110] sm:$0xff]  ;;  %v69_v36 = vld [vmem:[%s2491_s0 + $0x118] sm:$0xff]  ;;  %p1830_p4 = pnand %p1829_p3, %p1823_p0 }
  0x1e   :  { %v70_v37 = vld [vmem:[%s2491_s0 + $0x120] sm:$0xff]  ;;  %v71_v38 = vld [vmem:[%s2491_s0 + $0x128] sm:$0xff]  ;;  %v72_v39 = vld [vmem:[%s2491_s0 + $0x130] sm:$0xff] }
  0x1f   :  { %v73_v40 = vld [vmem:[%s2491_s0 + $0x138] sm:$0xff]  ;;  %v74_v41 = vld [vmem:[%s2491_s0 + $0x140] sm:$0xff]  ;;  %v75_v42 = vld [vmem:[%s2491_s0 + $0x148] sm:$0xff] }
  0x20   :  { %1746 = vmatmul.mubr.msk.f32.gmra.mxu0 %vm106_vm1, %v49_v16  ;;  %v76_v43 = vld [vmem:[%s2491_s0 + $0x150] sm:$0xff]  ;;  %v77_v44 = vld [vmem:[%s2491_s0 + $0x158] sm:$0xff]  ;;  %v78_v45 = vld [vmem:[%s2491_s0 + $0x160] sm:$0xff] }
  0x21   :  { %1748 = vmatprep.mubr.msk.f32.mxu0 %vm106_vm1, %v50_v17  ;;  %v79_v46 = vld [vmem:[%s2491_s0 + $0x168] sm:$0xff]  ;;  %v80_v47 = vld [vmem:[%s2491_s0 + $0x170] sm:$0xff]  ;;  %v81_v48 = vld [vmem:[%s2491_s0 + $0x178] sm:$0xff] }
  0x22   :  { %v82_v49 = vld [vmem:[%s2491_s0 + $0x180] sm:$0xff]  ;;  %v83_v50 = vld [vmem:[%s2491_s0 + $0x188] sm:$0xff]  ;;  %v84_v51 = vld [vmem:[%s2491_s0 + $0x190] sm:$0xff] }
  0x23   :  { %v85_v52 = vld [vmem:[%s2491_s0 + $0x198] sm:$0xff]  ;;  %v86_v53 = vld [vmem:[%s2491_s0 + $0x1a0] sm:$0xff]  ;;  %v87_v54 = vld [vmem:[%s2491_s0 + $0x1a8] sm:$0xff] }
  0x24   :  { %1749 = vmatmul.mubr.msk.f32.gmra.mxu0 %vm106_vm1, %v51_v18  ;;  %v88_v55 = vld [vmem:[%s2491_s0 + $0x1b0] sm:$0xff]  ;;  %v89_v56 = vld [vmem:[%s2491_s0 + $0x1b8] sm:$0xff]  ;;  %v90_v57 = vld [vmem:[%s2491_s0 + $0x1c0] sm:$0xff] }
  0x25   :  { %1751 = vmatprep.mubr.msk.f32.mxu0 %vm106_vm1, %v52_v19  ;;  %v91_v58 = vld [vmem:[%s2491_s0 + $0x1c8] sm:$0xff]  ;;  %v92_v59 = vld [vmem:[%s2491_s0 + $0x1d0] sm:$0xff]  ;;  %v93_v60 = vld [vmem:[%s2491_s0 + $0x1d8] sm:$0xff] }
  0x26   :  { %v94_v61 = vld [vmem:[%s2491_s0 + $0x1e0] sm:$0xff]  ;;  %v95_v62 = vld [vmem:[%s2491_s0 + $0x1e8] sm:$0xff]  ;;  %v96_v63 = vld [vmem:[%s2491_s0 + $0x1f0] sm:$0xff] }
  0x27   :  { %v97_v0 = vld [vmem:[%s2491_s0 + $0x1f8] sm:$0xff]  ;;  %v853_v1 = vld [vmem:[%s2494_s3 + $0xc8] sm:$0xff]  ;;  %v852_v3 = vld [vmem:[%s2494_s3 + $0xc0] sm:$0xff] }
  0x28   :  { %1752 = vmatmul.mubr.msk.f32.gmra.mxu0 %vm106_vm1, %v53_v20  ;;  %v917_v2 = vunpack.c.h.s8.bf16 %v853_v1  ;;  %v916_v4 = vunpack.c.h.s8.bf16 %v852_v3  ;;  %v909_v5 = vunpack.c.l.s8.bf16 %v853_v1  ;;  %v2164_v6 = vld [vmem:[%s2493_s2] ss:$0 sm:$0xff]  ;;  %v908_v7 = vunpack.c.l.s8.bf16 %v852_v3  ;;  %v845_v9 = vld [vmem:[%s2494_s3 + $0x88] sm:$0xff] }
  0x29   :  { %1754 = vmatprep.mubr.msk.f32.mxu0 %vm106_vm1, %v54_v21  ;;  %v901_v11 = vunpack.c.h.s8.bf16 %v845_v9  ;;  %v844_v12 = vld [vmem:[%s2494_s3 + $0x80] sm:$0xff]  ;;  %v893_v19 = vunpack.c.l.s8.bf16 %v845_v9 }
  0x2a   :  { %934 = vmatprep.subr.bf16.mxu1 %v917_v2  ;;  %v900_v14 = vunpack.c.h.s8.bf16 %v844_v12  ;;  %v892_v21 = vunpack.c.l.s8.bf16 %v844_v12 }
  0x2b   :  { %935 = vmatpush1.bf16.msra.mxu1 %v916_v4 }
  0x2c   :  { %1755 = vmatmul.mubr.msk.f32.gmra.mxu0 %vm106_vm1, %v55_v22  ;;  %936 = vmatprep.subr.bf16.mxu1 %v909_v5 }
  0x2d   :  { %1757 = vmatprep.mubr.msk.f32.mxu0 %vm106_vm1, %v56_v23 }
  0x2f   :  { %937 = vmatpush1.bf16.msra.mxu1 %v908_v7  ;;  %v1844_v7 = vmov 0  }
  0x30   :  { %1758 = vmatmul.mubr.msk.f32.gmra.mxu0 %vm106_vm1, %v57_v24  ;;  %938 = vmatprep.subr.bf16.mxu1 %v901_v11 }
  0x31   :  { %1760 = vmatprep.mubr.msk.f32.mxu0 %vm106_vm1, %v58_v25  ;;  %966 = vmatprep.mubr.bf16.mxu1 %v1844_v7 }
  0x33   :  { %939 = vmatpush1.bf16.msra.mxu1 %v900_v14 }
  0x34   :  { %1761 = vmatmul.mubr.msk.f32.gmra.mxu0 %vm106_vm1, %v59_v26  ;;  %940 = vmatprep.subr.bf16.mxu1 %v893_v19  ;;  %v837_v26 = vld [vmem:[%s2494_s3 + $0x48] sm:$0xff] }
  0x35   :  { %1763 = vmatprep.mubr.msk.f32.mxu0 %vm106_vm1, %v60_v27 }
  0x37   :  { %941 = vmatpush1.bf16.msra.mxu1 %v892_v21 }
  0x38   :  { %1764 = vmatmul.mubr.msk.f32.gmra.mxu0 %vm106_vm1, %v61_v28  ;;  %v885_v28 = vunpack.c.h.s8.bf16 %v837_v26 }
  0x39   :  { %1766 = vmatprep.mubr.msk.f32.mxu0 %vm106_vm1, %v62_v29  ;;  %v836_v29 = vld [vmem:[%s2494_s3 + $0x40] sm:$0xff] }
  0x3a   :  { %942 = vmatprep.subr.bf16.mxu1 %v885_v28 }
  0x3c   :  { %1767 = vmatmul.mubr.msk.f32.gmra.mxu0 %vm106_vm1, %v63_v30 }
  0x3d   :  { %1769 = vmatprep.mubr.msk.f32.mxu0 %vm106_vm1, %v64_v31  ;;  %v884_v31 = vunpack.c.h.s8.bf16 %v836_v29 }
  0x3f   :  { %943 = vmatpush1.bf16.msra.mxu1 %v884_v31 }
  0x40   :  { %1770 = vmatmul.mubr.msk.f32.gmra.mxu0 %vm106_vm1, %v65_v32 }
  0x41   :  { %1772 = vmatprep.mubr.msk.f32.mxu0 %vm106_vm1, %v66_v33 }
  0x44   :  { %1773 = vmatmul.mubr.msk.f32.gmra.mxu0 %vm106_vm1, %v67_v34 }
  0x45   :  { %1775 = vmatprep.mubr.msk.f32.mxu0 %vm106_vm1, %v68_v35 }
  0x48   :  { %1776 = vmatmul.mubr.msk.f32.gmra.mxu0 %vm106_vm1, %v69_v36 }
  0x49   :  { %1778 = vmatprep.mubr.msk.f32.mxu0 %vm106_vm1, %v70_v37 }
  0x4c   :  { %1779 = vmatmul.mubr.msk.f32.gmra.mxu0 %vm106_vm1, %v71_v38 }
  0x4d   :  { %1781 = vmatprep.mubr.msk.f32.mxu0 %vm106_vm1, %v72_v39  ;;  %v877_v39 = vunpack.c.l.s8.bf16 %v837_v26 }
  0x4f   :  { %944 = vmatprep.subr.bf16.mxu1 %v877_v39 }
  0x50   :  { %1782 = vmatmul.mubr.msk.f32.gmra.mxu0 %vm106_vm1, %v73_v40 }
  0x51   :  { %1784 = vmatprep.mubr.msk.f32.mxu0 %vm106_vm1, %v74_v41  ;;  %v876_v41 = vunpack.c.l.s8.bf16 %v836_v29 }
  0x53   :  { %945 = vmatpush1.bf16.msra.mxu1 %v876_v41 }
  0x54   :  { %1785 = vmatmul.mubr.msk.f32.gmra.mxu0 %vm106_vm1, %v75_v42 }
  0x55   :  { %1787 = vmatprep.mubr.msk.f32.mxu0 %vm106_vm1, %v76_v43 }
  0x58   :  { %1788 = vmatmul.mubr.msk.f32.gmra.mxu0 %vm106_vm1, %v77_v44 }
  0x59   :  { %1790 = vmatprep.mubr.msk.f32.mxu0 %vm106_vm1, %v78_v45 }
  0x5c   :  { %1791 = vmatmul.mubr.msk.f32.gmra.mxu0 %vm106_vm1, %v79_v46 }
  0x5d   :  { %1793 = vmatprep.mubr.msk.f32.mxu0 %vm106_vm1, %v80_v47  ;;  %v829_v47 = vld [vmem:[%s2494_s3 + $0x8] sm:$0xff] }
  0x60   :  { %1794 = vmatmul.mubr.msk.f32.gmra.mxu0 %vm106_vm1, %v81_v48 }
  0x61   :  { %1796 = vmatprep.mubr.msk.f32.mxu0 %vm106_vm1, %v82_v49 }
  0x64   :  { %1797 = vmatmul.mubr.msk.f32.gmra.mxu0 %vm106_vm1, %v83_v50  ;;  %v869_v50 = vunpack.c.h.s8.bf16 %v829_v47 }
  0x65   :  { %1799 = vmatprep.mubr.msk.f32.mxu0 %vm106_vm1, %v84_v51  ;;  %v828_v51 = vld [vmem:[%s2494_s3] sm:$0xff] }
  0x66   :  { %946 = vmatprep.subr.bf16.mxu1 %v869_v50 }
  0x68   :  { %1800 = vmatmul.mubr.msk.f32.gmra.mxu0 %vm106_vm1, %v85_v52 }
  0x69   :  { %1802 = vmatprep.mubr.msk.f32.mxu0 %vm106_vm1, %v86_v53  ;;  %v868_v53 = vunpack.c.h.s8.bf16 %v828_v51 }
  0x6b   :  { %947 = vmatpush1.bf16.msra.mxu1 %v868_v53 }
  0x6c   :  { %1803 = vmatmul.mubr.msk.f32.gmra.mxu0 %vm106_vm1, %v87_v54 }
  0x6d   :  { %1805 = vmatprep.mubr.msk.f32.mxu0 %vm106_vm1, %v88_v55 }
  0x70   :  { %1806 = vmatmul.mubr.msk.f32.gmra.mxu0 %vm106_vm1, %v89_v56 }
  0x71   :  { %1808 = vmatprep.mubr.msk.f32.mxu0 %vm106_vm1, %v90_v57 }
  0x74   :  { %1809 = vmatmul.mubr.msk.f32.gmra.mxu0 %vm106_vm1, %v91_v58 }
  0x75   :  { %1811 = vmatprep.mubr.msk.f32.mxu0 %vm106_vm1, %v92_v59 }
  0x78   :  { %1812 = vmatmul.mubr.msk.f32.gmra.mxu0 %vm106_vm1, %v93_v60 }
  0x79   :  { %1814 = vmatprep.mubr.msk.f32.mxu0 %vm106_vm1, %v94_v61  ;;  %v861_v61 = vunpack.c.l.s8.bf16 %v829_v47 }
  0x7b   :  { %948 = vmatprep.subr.bf16.mxu1 %v861_v61 }
  0x7c   :  { %1815 = vmatmul.mubr.msk.f32.gmra.mxu0 %vm106_vm1, %v95_v62  ;;  %v2197_v62 = vld [vmem:[%s2494_s3 + $0xd8] sm:$0xff] }
  0x7d   :  { %1817 = vmatprep.mubr.msk.f32.mxu0 %vm106_vm1, %v96_v63  ;;  %v919_v1 = vunpack.c.h.s8.bf16 %v2197_v62 }
  0x80   :  { %1818 = vmatmul.mubr.msk.f32.gmra.mxu0 %vm106_vm1, %v97_v0  ;;  %v860_v0 = vunpack.c.l.s8.bf16 %v828_v51 }
  0x82   :  { %949 = vmatpush1.bf16.msra.mxu1 %v860_v0 }
  0x83   :  { %975 = vmatprep.subr.bf16.mxu1 %v919_v1 }
  0xc4   :  { %v1726_v8 = vpop.f32.mrf.mxu0 }
  0xc5   :  { %v375_v10 = vadd.f32 %v1726_v8, %v2164_v6 }
  0xc6   :  { %v369_v13 = vpop.f32.mrf.mxu0 }
  0xc7   :  { %v370_v15 = vadd.f32 %v2164_v6, %v369_v13  ;;  %v689_v17 = vmax.f32 %v375_v10, 0.0 }
  0xc8   :  { %v1729_v16 = vpop.f32.mrf.mxu0 }
  0xc9   :  { %v688_v18 = vmax.f32 %v370_v15, 0.0  ;;  %v385_v23 = vadd.f32 %v1729_v16, %v2164_v6 }
  0xca   :  { %v379_v20 = vpop.f32.mrf.mxu0 }
  0xcb   :  { %v752_v22 = vadd.f32 %v689_v17, %v688_v18  ;;  %v380_v24 = vadd.f32 %v2164_v6, %v379_v20  ;;  %v691_v32 = vmax.f32 %v385_v23, 0.0 }
  0xcc   :  { %v1732_v25 = vpop.f32.mrf.mxu0 }
  0xcd   :  { %v690_v27 = vmax.f32 %v380_v24, 0.0  ;;  %v395_v34 = vadd.f32 %v1732_v25, %v2164_v6 }
  0xce   :  { %v389_v30 = vpop.f32.mrf.mxu0 }
  0xcf   :  { %v753_v33 = vadd.f32 %v752_v22, %v690_v27  ;;  %v390_v35 = vadd.f32 %v2164_v6, %v389_v30  ;;  %v693_v42 = vmax.f32 %v395_v34, 0.0 }
  0xd0   :  { %v1735_v36 = vpop.f32.mrf.mxu0 }
  0xd1   :  { %v692_v37 = vmax.f32 %v390_v35, 0.0  ;;  %v754_v38 = vadd.f32 %v753_v33, %v691_v32  ;;  %v405_v44 = vadd.f32 %v1735_v36, %v2164_v6 }
  0xd2   :  { %v399_v40 = vpop.f32.mrf.mxu0 }
  0xd3   :  { %v755_v43 = vadd.f32 %v754_v38, %v692_v37  ;;  %v400_v45 = vadd.f32 %v2164_v6, %v399_v40  ;;  %v695_v54 = vmax.f32 %v405_v44, 0.0 }
  0xd4   :  { %v1738_v46 = vpop.f32.mrf.mxu0 }
  0xd5   :  { %v694_v48 = vmax.f32 %v400_v45, 0.0  ;;  %v756_v49 = vadd.f32 %v755_v43, %v693_v42  ;;  %v415_v56 = vadd.f32 %v1738_v46, %v2164_v6 }
  0xd6   :  { %v409_v52 = vpop.f32.mrf.mxu0 }
  0xd7   :  { %v757_v55 = vadd.f32 %v756_v49, %v694_v48  ;;  %v410_v57 = vadd.f32 %v2164_v6, %v409_v52  ;;  %v697_v2 = vmax.f32 %v415_v56, 0.0 }
  0xd8   :  { %v1741_v58 = vpop.f32.mrf.mxu0 }
  0xd9   :  { %v696_v59 = vmax.f32 %v410_v57, 0.0  ;;  %v758_v60 = vadd.f32 %v757_v55, %v695_v54  ;;  %v425_v4 = vadd.f32 %v1741_v58, %v2164_v6 }
  0xda   :  { %v419_v63 = vpop.f32.mrf.mxu0 }
  0xdb   :  { %v759_v3 = vadd.f32 %v758_v60, %v696_v59  ;;  %v420_v5 = vadd.f32 %v2164_v6, %v419_v63  ;;  %v699_v12 = vmax.f32 %v425_v4, 0.0 }
  0xdc   :  { %v1744_v8 = vpop.f32.mrf.mxu0 }
  0xdd   :  { %v698_v9 = vmax.f32 %v420_v5, 0.0  ;;  %v760_v10 = vadd.f32 %v759_v3, %v697_v2  ;;  %v435_v14 = vadd.f32 %v1744_v8, %v2164_v6 }
  0xde   :  { %v429_v11 = vpop.f32.mrf.mxu0 }
  0xdf   :  { %v761_v13 = vadd.f32 %v760_v10, %v698_v9  ;;  %v430_v15 = vadd.f32 %v2164_v6, %v429_v11  ;;  %v701_v20 = vmax.f32 %v435_v14, 0.0 }
  0xe0   :  { %v1747_v16 = vpop.f32.mrf.mxu0 }
  0xe1   :  { %v700_v17 = vmax.f32 %v430_v15, 0.0  ;;  %v762_v18 = vadd.f32 %v761_v13, %v699_v12  ;;  %v445_v22 = vadd.f32 %v1747_v16, %v2164_v6 }
  0xe2   :  { %v439_v19 = vpop.f32.mrf.mxu0 }
  0xe3   :  { %v763_v21 = vadd.f32 %v762_v18, %v700_v17  ;;  %v440_v23 = vadd.f32 %v2164_v6, %v439_v19  ;;  %v703_v28 = vmax.f32 %v445_v22, 0.0 }
  0xe4   :  { %v1750_v24 = vpop.f32.mrf.mxu0 }
  0xe5   :  { %v702_v25 = vmax.f32 %v440_v23, 0.0  ;;  %v764_v26 = vadd.f32 %v763_v21, %v701_v20  ;;  %v455_v30 = vadd.f32 %v1750_v24, %v2164_v6 }
  0xe6   :  { %v449_v27 = vpop.f32.mrf.mxu0 }
  0xe7   :  { %v765_v29 = vadd.f32 %v764_v26, %v702_v25  ;;  %v450_v31 = vadd.f32 %v2164_v6, %v449_v27  ;;  %v705_v36 = vmax.f32 %v455_v30, 0.0 }
  0xe8   :  { %v1753_v32 = vpop.f32.mrf.mxu0 }
  0xe9   :  { %v704_v33 = vmax.f32 %v450_v31, 0.0  ;;  %v766_v34 = vadd.f32 %v765_v29, %v703_v28  ;;  %v465_v38 = vadd.f32 %v1753_v32, %v2164_v6 }
  0xea   :  { %v459_v35 = vpop.f32.mrf.mxu0 }
  0xeb   :  { %v767_v37 = vadd.f32 %v766_v34, %v704_v33  ;;  %v460_v39 = vadd.f32 %v2164_v6, %v459_v35  ;;  %v707_v44 = vmax.f32 %v465_v38, 0.0 }
  0xec   :  { %v1756_v40 = vpop.f32.mrf.mxu0 }
  0xed   :  { %v706_v41 = vmax.f32 %v460_v39, 0.0  ;;  %v768_v42 = vadd.f32 %v767_v37, %v705_v36  ;;  %v475_v46 = vadd.f32 %v1756_v40, %v2164_v6 }
  0xee   :  { %v469_v43 = vpop.f32.mrf.mxu0 }
  0xef   :  { %v769_v45 = vadd.f32 %v768_v42, %v706_v41  ;;  %v470_v47 = vadd.f32 %v2164_v6, %v469_v43  ;;  %v709_v52 = vmax.f32 %v475_v46, 0.0 }
  0xf0   :  { %v1759_v48 = vpop.f32.mrf.mxu0 }
  0xf1   :  { %v708_v49 = vmax.f32 %v470_v47, 0.0  ;;  %v770_v50 = vadd.f32 %v769_v45, %v707_v44  ;;  %v485_v54 = vadd.f32 %v1759_v48, %v2164_v6 }
  0xf2   :  { %v479_v51 = vpop.f32.mrf.mxu0 }
  0xf3   :  { %v771_v53 = vadd.f32 %v770_v50, %v708_v49  ;;  %v480_v55 = vadd.f32 %v2164_v6, %v479_v51  ;;  %v711_v60 = vmax.f32 %v485_v54, 0.0 }
  0xf4   :  { %v1762_v56 = vpop.f32.mrf.mxu0 }
  0xf5   :  { %v710_v57 = vmax.f32 %v480_v55, 0.0  ;;  %v772_v58 = vadd.f32 %v771_v53, %v709_v52  ;;  %v495_v63 = vadd.f32 %v1762_v56, %v2164_v6 }
  0xf6   :  { %v489_v59 = vpop.f32.mrf.mxu0 }
  0xf7   :  { %v773_v61 = vadd.f32 %v772_v58, %v710_v57  ;;  %v490_v0 = vadd.f32 %v2164_v6, %v489_v59  ;;  %v713_v5 = vmax.f32 %v495_v63, 0.0 }
  0xf8   :  { %v1765_v1 = vpop.f32.mrf.mxu0 }
  0xf9   :  { %v712_v2 = vmax.f32 %v490_v0, 0.0  ;;  %v774_v3 = vadd.f32 %v773_v61, %v711_v60  ;;  %v505_v9 = vadd.f32 %v1765_v1, %v2164_v6 }
  0xfa   :  { %v499_v4 = vpop.f32.mrf.mxu0 }
  0xfb   :  { %v775_v8 = vadd.f32 %v774_v3, %v712_v2  ;;  %v500_v10 = vadd.f32 %v2164_v6, %v499_v4  ;;  %v715_v15 = vmax.f32 %v505_v9, 0.0 }
  0xfc   :  { %v1768_v11 = vpop.f32.mrf.mxu0 }
  0xfd   :  { %v714_v12 = vmax.f32 %v500_v10, 0.0  ;;  %v776_v13 = vadd.f32 %v775_v8, %v713_v5  ;;  %v515_v17 = vadd.f32 %v1768_v11, %v2164_v6 }
  0xfe   :  { %v509_v14 = vpop.f32.mrf.mxu0 }
  0xff   :  { %v777_v16 = vadd.f32 %v776_v13, %v714_v12  ;;  %v510_v18 = vadd.f32 %v2164_v6, %v509_v14  ;;  %v717_v23 = vmax.f32 %v515_v17, 0.0 }
 0x100   :  { %v1771_v19 = vpop.f32.mrf.mxu0 }
 0x101   :  { %v716_v20 = vmax.f32 %v510_v18, 0.0  ;;  %v778_v21 = vadd.f32 %v777_v16, %v715_v15  ;;  %v525_v25 = vadd.f32 %v1771_v19, %v2164_v6 }
 0x102   :  { %v519_v22 = vpop.f32.mrf.mxu0 }
 0x103   :  { %v779_v24 = vadd.f32 %v778_v21, %v716_v20  ;;  %v520_v26 = vadd.f32 %v2164_v6, %v519_v22  ;;  %v719_v31 = vmax.f32 %v525_v25, 0.0 }
 0x104   :  { %v1774_v27 = vpop.f32.mrf.mxu0 }
 0x105   :  { %v718_v28 = vmax.f32 %v520_v26, 0.0  ;;  %v780_v29 = vadd.f32 %v779_v24, %v717_v23  ;;  %v535_v33 = vadd.f32 %v1774_v27, %v2164_v6 }
 0x106   :  { %v529_v30 = vpop.f32.mrf.mxu0 }
 0x107   :  { %v781_v32 = vadd.f32 %v780_v29, %v718_v28  ;;  %v530_v34 = vadd.f32 %v2164_v6, %v529_v30  ;;  %v721_v39 = vmax.f32 %v535_v33, 0.0 }
 0x108   :  { %v1777_v35 = vpop.f32.mrf.mxu0 }
 0x109   :  { %v2225_v36 = vadd.f32 %v781_v32, %v719_v31  ;;  %v720_v37 = vmax.f32 %v530_v34, 0.0  ;;  %v545_v40 = vadd.f32 %v1777_v35, %v2164_v6 }
 0x10a   :  { %v539_v38 = vpop.f32.mrf.mxu0 }
 0x10b   :  { %v540_v41 = vadd.f32 %v2164_v6, %v539_v38  ;;  %v789_v43 = vadd.f32 %v721_v39, %v720_v37  ;;  %v723_v46 = vmax.f32 %v545_v40, 0.0 }
 0x10c   :  { %v1780_v42 = vpop.f32.mrf.mxu0 }
 0x10d   :  { %v722_v44 = vmax.f32 %v540_v41, 0.0  ;;  %v555_v48 = vadd.f32 %v1780_v42, %v2164_v6 }
 0x10e   :  { %v549_v45 = vpop.f32.mrf.mxu0 }
 0x10f   :  { %v790_v47 = vadd.f32 %v789_v43, %v722_v44  ;;  %v550_v49 = vadd.f32 %v2164_v6, %v549_v45  ;;  %v725_v54 = vmax.f32 %v555_v48, 0.0 }
 0x110   :  { %v1783_v50 = vpop.f32.mrf.mxu0 }
 0x111   :  { %v724_v51 = vmax.f32 %v550_v49, 0.0  ;;  %v791_v52 = vadd.f32 %v790_v47, %v723_v46  ;;  %v565_v56 = vadd.f32 %v1783_v50, %v2164_v6 }
 0x112   :  { %v559_v53 = vpop.f32.mrf.mxu0 }
 0x113   :  { %v792_v55 = vadd.f32 %v791_v52, %v724_v51  ;;  %v560_v57 = vadd.f32 %v2164_v6, %v559_v53  ;;  %v727_v63 = vmax.f32 %v565_v56, 0.0 }
 0x114   :  { %v1786_v58 = vpop.f32.mrf.mxu0 }
 0x115   :  { %v726_v59 = vmax.f32 %v560_v57, 0.0  ;;  %v793_v60 = vadd.f32 %v792_v55, %v725_v54  ;;  %v575_v1 = vadd.f32 %v1786_v58, %v2164_v6 }
 0x116   :  { %v569_v61 = vpop.f32.mrf.mxu0 }
 0x117   :  { %v794_v0 = vadd.f32 %v793_v60, %v726_v59  ;;  %v570_v2 = vadd.f32 %v2164_v6, %v569_v61  ;;  %v729_v9 = vmax.f32 %v575_v1, 0.0 }
 0x118   :  { %v1789_v3 = vpop.f32.mrf.mxu0 }
 0x119   :  { %v728_v4 = vmax.f32 %v570_v2, 0.0  ;;  %v795_v5 = vadd.f32 %v794_v0, %v727_v63  ;;  %v585_v11 = vadd.f32 %v1789_v3, %v2164_v6 }
 0x11a   :  { %v579_v8 = vpop.f32.mrf.mxu0 }
 0x11b   :  { %v796_v10 = vadd.f32 %v795_v5, %v728_v4  ;;  %v580_v12 = vadd.f32 %v2164_v6, %v579_v8  ;;  %v731_v17 = vmax.f32 %v585_v11, 0.0 }
 0x11c   :  { %v1792_v13 = vpop.f32.mrf.mxu0 }
 0x11d   :  { %v730_v14 = vmax.f32 %v580_v12, 0.0  ;;  %v797_v15 = vadd.f32 %v796_v10, %v729_v9  ;;  %v595_v19 = vadd.f32 %v1792_v13, %v2164_v6  ;;  %v783_v12 = vrot.slane %v2225_v36, 4 }
 0x11e   :  { %v589_v16 = vpop.f32.mrf.mxu0 }
 0x11f   :  { %v798_v18 = vadd.f32 %v797_v15, %v730_v14  ;;  %v590_v20 = vadd.f32 %v2164_v6, %v589_v16  ;;  %v733_v25 = vmax.f32 %v595_v19, 0.0 }
 0x120   :  { %v1795_v21 = vpop.f32.mrf.mxu0 }
 0x121   :  { %v732_v22 = vmax.f32 %v590_v20, 0.0  ;;  %v799_v23 = vadd.f32 %v798_v18, %v731_v17  ;;  %v605_v27 = vadd.f32 %v1795_v21, %v2164_v6  ;;  %v784_v21 = vadd.f32 %v783_v12, %v2225_v36 }
 0x122   :  { %v599_v24 = vpop.f32.mrf.mxu0 }
 0x123   :  { %v800_v26 = vadd.f32 %v799_v23, %v732_v22  ;;  %v600_v28 = vadd.f32 %v2164_v6, %v599_v24  ;;  %v735_v33 = vmax.f32 %v605_v27, 0.0  ;;  %v785_v36 = vrot.slane %v784_v21, 2 }
 0x124   :  { %v1798_v29 = vpop.f32.mrf.mxu0 }
 0x125   :  { %v734_v30 = vmax.f32 %v600_v28, 0.0  ;;  %v801_v31 = vadd.f32 %v800_v26, %v733_v25  ;;  %v615_v35 = vadd.f32 %v1798_v29, %v2164_v6  ;;  %v1213_v28 = vld [vmem:[%s2497_s6 + $0x38] sm:$0xff] }
 0x126   :  { %v609_v32 = vpop.f32.mrf.mxu0  ;;  %v1209_v29 = vld [vmem:[%s2497_s6 + $0x18] sm:$0xff] }
 0x127   :  { %v802_v34 = vadd.f32 %v801_v31, %v734_v30  ;;  %v610_v37 = vadd.f32 %v2164_v6, %v609_v32  ;;  %v737_v42 = vmax.f32 %v615_v35, 0.0  ;;  %v1253_v32 = vunpack.c.h.s8.bf16 %v1213_v28 }
 0x128   :  { %v1801_v38 = vpop.f32.mrf.mxu0  ;;  %v1252_v35 = vunpack.c.l.s8.bf16 %v1213_v28 }
 0x129   :  { %v736_v39 = vmax.f32 %v610_v37, 0.0  ;;  %v803_v40 = vadd.f32 %v802_v34, %v735_v33  ;;  %v625_v44 = vadd.f32 %v1801_v38, %v2164_v6  ;;  %v1245_v34 = vunpack.c.h.s8.bf16 %v1209_v29  ;;  %v1212_v37 = vld [vmem:[%s2497_s6 + $0x30] sm:$0xff]  ;;  %1634 = vmatprep.subr.bf16.mxu0 %v1253_v32  ;;  %v857_v32 = vld [vmem:[%s2494_s3 + $0xe8] sm:$0xff] }
 0x12a   :  { %v619_v41 = vpop.f32.mrf.mxu0 }
 0x12b   :  { %v804_v43 = vadd.f32 %v803_v40, %v736_v39  ;;  %v620_v45 = vadd.f32 %v2164_v6, %v619_v41  ;;  %v739_v50 = vmax.f32 %v625_v44, 0.0  ;;  %1635 = vmatpush3.bf16.msra.mxu0 %v1245_v34  ;;  %v856_v34 = vld [vmem:[%s2494_s3 + $0xe0] sm:$0xff] }
 0x12c   :  { %v1804_v46 = vpop.f32.mrf.mxu0  ;;  %1636 = vmatprep.subr.bf16.mxu0 %v1252_v35  ;;  %v920_v35 = vunpack.c.h.s8.bf16 %v856_v34 }
 0x12d   :  { %v738_v47 = vmax.f32 %v620_v45, 0.0  ;;  %v805_v48 = vadd.f32 %v804_v43, %v737_v42  ;;  %v635_v52 = vadd.f32 %v1804_v46, %v2164_v6  ;;  %v1244_v42 = vunpack.c.l.s8.bf16 %v1209_v29  ;;  %v1208_v46 = vld [vmem:[%s2497_s6 + $0x10] sm:$0xff] }
 0x12e   :  { %v629_v49 = vpop.f32.mrf.mxu0  ;;  %v1251_v45 = vunpack.c.h.s8.bf16 %v1212_v37  ;;  %v830_v29 = vld [vmem:[%s2494_s3 + $0x10] sm:$0xff] }
 0x12f   :  { %v806_v51 = vadd.f32 %v805_v48, %v738_v47  ;;  %v630_v53 = vadd.f32 %v2164_v6, %v629_v49  ;;  %v741_v58 = vmax.f32 %v635_v52, 0.0  ;;  %v786_v47 = vadd.f32 %v785_v36, %v784_v21  ;;  %1637 = vmatpush3.bf16.msra.mxu0 %v1244_v42 }
 0x130   :  { %v1807_v54 = vpop.f32.mrf.mxu0  ;;  %1638 = vmatprep.subr.bf16.mxu0 %v1251_v45  ;;  %v1250_v52 = vunpack.c.l.s8.bf16 %v1212_v37  ;;  %v862_v36 = vunpack.c.l.s8.bf16 %v830_v29  ;;  %v913_v37 = vunpack.c.l.s8.bf16 %v857_v32 }
 0x131   :  { %v740_v55 = vmax.f32 %v630_v53, 0.0  ;;  %v807_v56 = vadd.f32 %v806_v51, %v739_v50  ;;  %v645_v60 = vadd.f32 %v1807_v54, %v2164_v6  ;;  %v1243_v50 = vunpack.c.h.s8.bf16 %v1208_v46 }
 0x132   :  { %v639_v57 = vpop.f32.mrf.mxu0  ;;  %v787_v53 = vrot.slane %v786_v47, 1 }
 0x133   :  { %v808_v59 = vadd.f32 %v807_v56, %v740_v55  ;;  %v640_v61 = vadd.f32 %v2164_v6, %v639_v57  ;;  %v743_v3 = vmax.f32 %v645_v60, 0.0  ;;  %1639 = vmatpush3.bf16.msra.mxu0 %v1243_v50  ;;  %v1242_v55 = vunpack.c.l.s8.bf16 %v1208_v46  ;;  %v833_v50 = vld [vmem:[%s2494_s3 + $0x28] sm:$0xff] }
 0x134   :  { %v1810_v63 = vpop.f32.mrf.mxu0  ;;  %1640 = vmatprep.subr.bf16.mxu0 %v1250_v52  ;;  %v873_v52 = vunpack.c.h.s8.bf16 %v833_v50 }
 0x135   :  { %v742_v0 = vmax.f32 %v640_v61, 0.0  ;;  %v809_v1 = vadd.f32 %v808_v59, %v741_v58  ;;  %v655_v5 = vadd.f32 %v1810_v63, %v2164_v6  ;;  %v2280_v58 = vld [vmem:[%s2497_s6 + $0x8] sm:$0xff]  ;;  %v788_v59 = vadd.f32 %v787_v53, %v786_v47  ;;  %v840_v47 = vld [vmem:[%s2494_s3 + $0x60] sm:$0xff] }
 0x136   :  { %v649_v2 = vpop.f32.mrf.mxu0  ;;  %v1241_v61 = vunpack.c.h.s8.bf16 %v2280_v58  ;;  %v832_v53 = vld [vmem:[%s2494_s3 + $0x20] sm:$0xff] }
 0x137   :  { %v810_v4 = vadd.f32 %v809_v1, %v742_v0  ;;  %v650_v8 = vadd.f32 %v2164_v6, %v649_v2  ;;  %v745_v14 = vmax.f32 %v655_v5, 0.0  ;;  %1641 = vmatpush3.bf16.msra.mxu0 %v1242_v55  ;;  %v826_v0 = vmul.f32 0.00390625, %v788_v59 }
 0x138   :  { %v1813_v9 = vpop.f32.mrf.mxu0  ;;  %v865_v55 = vunpack.c.l.s8.bf16 %v833_v50 }
 0x139   :  { %v744_v10 = vmax.f32 %v650_v8, 0.0  ;;  %v811_v11 = vadd.f32 %v810_v4, %v743_v3  ;;  %v665_v16 = vadd.f32 %v1813_v9, %v2164_v6  ;;  %v924_v3 = vpack.c.bf16 %v826_v0, %v826_v0  ;;  %v854_v8 = vld [vmem:[%s2494_s3 + $0xd0] sm:$0xff]  ;;  %v851_v0 = vld [vmem:[%s2494_s3 + $0xb8] sm:$0xff] }
 0x13a   :  { %v659_v13 = vpop.f32.mrf.mxu0  ;;  %v918_v12 = vunpack.c.h.s8.bf16 %v854_v8 }
 0x13b   :  { %v812_v15 = vadd.f32 %v811_v11, %v744_v10  ;;  %v660_v17 = vadd.f32 %v2164_v6, %v659_v13  ;;  %v747_v23 = vmax.f32 %v665_v16, 0.0  ;;  %v928_v9 = vunpack.c.l.b16 %v924_v3 }
 0x13c   :  { %v1816_v18 = vpop.f32.mrf.mxu0  ;;  %v910_v16 = vunpack.c.l.s8.bf16 %v854_v8  ;;  %v1210_v8 = vld [vmem:[%s2497_s6 + $0x20] sm:$0xff] }
 0x13d   :  { %v746_v19 = vmax.f32 %v660_v17, 0.0  ;;  %v813_v20 = vadd.f32 %v812_v15, %v745_v14  ;;  %v675_v25 = vadd.f32 %v1816_v18, %v2164_v6  ;;  %v911_v14 = vunpack.c.l.s8.bf16 %v2197_v62  ;;  %v847_v15 = vld [vmem:[%s2494_s3 + $0x98] sm:$0xff]  ;;  %v846_v18 = vld [vmem:[%s2494_s3 + $0x90] sm:$0xff] }
 0x13e   :  { %v669_v22 = vpop.f32.mrf.mxu0  ;;  %v903_v17 = vunpack.c.h.s8.bf16 %v847_v15  ;;  %v895_v62 = vunpack.c.l.s8.bf16 %v847_v15  ;;  %v894_v21 = vunpack.c.l.s8.bf16 %v846_v18 }
 0x13f   :  { %v814_v24 = vadd.f32 %v813_v20, %v746_v19  ;;  %v670_v26 = vadd.f32 %v2164_v6, %v669_v22  ;;  %v749_v38 = vmax.f32 %v675_v25, 0.0  ;;  %v902_v19 = vunpack.c.h.s8.bf16 %v846_v18  ;;  %v839_v20 = vld [vmem:[%s2494_s3 + $0x58] sm:$0xff] }
 0x140   :  { %v1819_v27 = vpop.f32.mrf.mxu0  ;;  %v887_v22 = vunpack.c.h.s8.bf16 %v839_v20  ;;  %v879_v25 = vunpack.c.l.s8.bf16 %v839_v20 }
 0x141   :  { %v748_v30 = vmax.f32 %v670_v26, 0.0  ;;  %v815_v31 = vadd.f32 %v814_v24, %v747_v23  ;;  %v685_v40 = vadd.f32 %v1819_v27, %v2164_v6  ;;  %v838_v23 = vld [vmem:[%s2494_s3 + $0x50] sm:$0xff]  ;;  %v831_v26 = vld [vmem:[%s2494_s3 + $0x18] sm:$0xff] }
 0x142   :  { %v679_v33 = vpop.f32.mrf.mxu0  ;;  %v886_v24 = vunpack.c.h.s8.bf16 %v838_v23  ;;  %v878_v27 = vunpack.c.l.s8.bf16 %v838_v23  ;;  %v871_v28 = vunpack.c.h.s8.bf16 %v831_v26 }
 0x143   :  { %v816_v39 = vadd.f32 %v815_v31, %v748_v30  ;;  %v680_v41 = vadd.f32 %v2164_v6, %v679_v33  ;;  %v751_v48 = vmax.f32 %v685_v40, 0.0  ;;  %v2274_v6 = vld [vmem:[%s2497_s6 + $0x28] sm:$0xff]  ;;  %v870_v30 = vunpack.c.h.s8.bf16 %v830_v29 }
 0x144   :  { %v1249_v57 = vunpack.c.h.s8.bf16 %v2274_v6  ;;  %v863_v31 = vunpack.c.l.s8.bf16 %v831_v26  ;;  %v921_v33 = vunpack.c.h.s8.bf16 %v857_v32 }
 0x145   :  { %v750_v43 = vmax.f32 %v680_v41, 0.0  ;;  %v817_v44 = vadd.f32 %v816_v39, %v749_v38  ;;  %v849_v38 = vld [vmem:[%s2494_s3 + $0xa8] sm:$0xff]  ;;  %v912_v39 = vunpack.c.l.s8.bf16 %v856_v34  ;;  %v848_v41 = vld [vmem:[%s2494_s3 + $0xa0] sm:$0xff] }
 0x146   :  { %1642 = vmatprep.subr.bf16.mxu0 %v1249_v57  ;;  %v905_v40 = vunpack.c.h.s8.bf16 %v849_v38  ;;  %v904_v42 = vunpack.c.h.s8.bf16 %v848_v41  ;;  %v896_v45 = vunpack.c.l.s8.bf16 %v848_v41  ;;  %v864_v57 = vunpack.c.l.s8.bf16 %v832_v53 }
 0x147   :  { %v818_v49 = vadd.f32 %v817_v44, %v750_v43  ;;  %1643 = vmatpush3.bf16.msra.mxu0 %v1241_v61  ;;  %v897_v43 = vunpack.c.l.s8.bf16 %v849_v38  ;;  %v841_v44 = vld [vmem:[%s2494_s3 + $0x68] sm:$0xff] }
 0x148   :  { %v889_v46 = vunpack.c.h.s8.bf16 %v841_v44 }
 0x149   :  { %v819_v51 = vadd.f32 %v818_v49, %v751_v48  ;;  %v888_v48 = vunpack.c.h.s8.bf16 %v840_v47  ;;  %v881_v49 = vunpack.c.l.s8.bf16 %v841_v44  ;;  %v1218_v44 = vld [vmem:[%s2497_s6 + $0x60] sm:$0xff] }
 0x14b   :  { %v820_v54 = vrot.slane %v819_v51, 4 }
 0x14d   :  { %v821_v56 = vadd.f32 %v820_v54, %v819_v51  ;;  %v880_v51 = vunpack.c.l.s8.bf16 %v840_v47  ;;  %v872_v54 = vunpack.c.h.s8.bf16 %v832_v53  ;;  %v1214_v47 = vld [vmem:[%s2497_s6 + $0x40] sm:$0xff]  ;;  %v1100_v53 = vlaneseq }
 0x14e   :  { %v1254_v50 = vunpack.c.l.s8.bf16 %v1214_v47 }
 0x14f   :  { %v822_v60 = vrot.slane %v821_v56, 2 }
 0x151   :  { %v823_v63 = vadd.f32 %v822_v60, %v821_v56  ;;  %v859_v56 = vld [vmem:[%s2494_s3 + $0xf8] sm:$0xff]  ;;  %v858_v60 = vld [vmem:[%s2494_s3 + $0xf0] sm:$0xff] }
 0x152   :  { %v923_v59 = vunpack.c.h.s8.bf16 %v859_v56  ;;  %v922_v61 = vunpack.c.h.s8.bf16 %v858_v60  ;;  %v914_v3 = vunpack.c.l.s8.bf16 %v858_v60 }
 0x153   :  { %v824_v1 = vrot.slane %v823_v63, 1 }
 0x155   :  { %v825_v2 = vadd.f32 %v824_v1, %v823_v63  ;;  %v915_v63 = vunpack.c.l.s8.bf16 %v859_v56  ;;  %v1248_v1 = vunpack.c.l.s8.bf16 %v2274_v6  ;;  %v1247_v6 = vunpack.c.h.s8.bf16 %v1210_v8  ;;  %v2409_v56 = vld [vmem:[%s2495_s4] sm:$0xff] }
 0x157   :  { %v827_v4 = vmul.f32 0.00390625, %v825_v2  ;;  %v1240_v2 = vunpack.c.l.s8.bf16 %v2280_v58  ;;  %1644 = vmatprep.subr.bf16.mxu0 %v1248_v1  ;;  %v1206_v58 = vld [vmem:[%s2497_s6] sm:$0xff] }
 0x159   :  { %v925_v5 = vpack.c.bf16 %v827_v4, %v827_v4  ;;  %v907_v4 = vunpack.c.h.s8.bf16 %v851_v0  ;;  %1645 = vmatpush3.bf16.msra.mxu0 %v1240_v2 }
 0x15a   :  { %1646 = vmatprep.subr.bf16.mxu0 %v1247_v6 }
 0x15b   :  { %v929_v10 = vunpack.c.l.b16 %v925_v5  ;;  %v850_v5 = vld [vmem:[%s2494_s3 + $0xb0] sm:$0xff] }
 0x15c   :  { %v898_v15 = vunpack.c.l.s8.bf16 %v850_v5 }
 0x15d   :  { %v931_v11 = vsel %vm930_vm2, %v929_v10, %v928_v9  ;;  %v1239_v9 = vunpack.c.h.s8.bf16 %v1206_v58  ;;  %v899_v10 = vunpack.c.l.s8.bf16 %v851_v0 }
 0x15e   :  { %v2286_v13 = vpack.c.b16 %v931_v11, %v931_v11  ;;  %v843_v11 = vld [vmem:[%s2494_s3 + $0x78] sm:$0xff] }
 0x15f   :  { %1647 = vmatpush3.bf16.msra.mxu0 %v1239_v9 }
 0x160   :  { %967 = vmatmul.mubr.bf16.vlgmr.msra.gmra.mxu1 %v2286_v13 }
 0x161   :  { %976 = vmatpush1.bf16.msra.mxu1 %v918_v12  ;;  %1007 = vmatprep.mubr.bf16.mxu1 %v1844_v7  ;;  %v1246_v12 = vunpack.c.l.s8.bf16 %v1210_v8 }
 0x162   :  { %977 = vmatprep.subr.bf16.mxu1 %v911_v14  ;;  %v1238_v14 = vunpack.c.l.s8.bf16 %v1206_v58 }
 0x163   :  { %1648 = vmatprep.subr.bf16.mxu0 %v1246_v12 }
 0x164   :  { %1649 = vmatpush3.bf16.msra.mxu0 %v1238_v14 }
 0x165   :  { %978 = vmatpush1.bf16.msra.mxu1 %v910_v16  ;;  %v891_v16 = vunpack.c.h.s8.bf16 %v843_v11 }
 0x166   :  { %979 = vmatprep.subr.bf16.mxu1 %v903_v17  ;;  %v842_v17 = vld [vmem:[%s2494_s3 + $0x70] sm:$0xff] }
 0x167   :  { %v890_v18 = vunpack.c.h.s8.bf16 %v842_v17  ;;  %v882_v20 = vunpack.c.l.s8.bf16 %v842_v17 }
 0x169   :  { %980 = vmatpush1.bf16.msra.mxu1 %v902_v19  ;;  %v883_v19 = vunpack.c.l.s8.bf16 %v843_v11 }
 0x16a   :  { %981 = vmatprep.subr.bf16.mxu1 %v895_v62  ;;  %v835_v62 = vld [vmem:[%s2494_s3 + $0x38] sm:$0xff] }
 0x16d   :  { %982 = vmatpush1.bf16.msra.mxu1 %v894_v21  ;;  %v875_v21 = vunpack.c.h.s8.bf16 %v835_v62 }
 0x16e   :  { %983 = vmatprep.subr.bf16.mxu1 %v887_v22  ;;  %v834_v22 = vld [vmem:[%s2494_s3 + $0x30] sm:$0xff] }
 0x16f   :  { %v874_v23 = vunpack.c.h.s8.bf16 %v834_v22  ;;  %v866_v26 = vunpack.c.l.s8.bf16 %v834_v22 }
 0x171   :  { %984 = vmatpush1.bf16.msra.mxu1 %v886_v24  ;;  %v867_v24 = vunpack.c.l.s8.bf16 %v835_v62 }
 0x172   :  { %985 = vmatprep.subr.bf16.mxu1 %v879_v25  ;;  %v1221_v25 = vld [vmem:[%s2497_s6 + $0x78] sm:$0xff] }
 0x175   :  { %986 = vmatpush1.bf16.msra.mxu1 %v878_v27  ;;  %v1269_v27 = vunpack.c.h.s8.bf16 %v1221_v25 }
 0x176   :  { %987 = vmatprep.subr.bf16.mxu1 %v871_v28  ;;  %v1217_v28 = vld [vmem:[%s2497_s6 + $0x58] sm:$0xff] }
 0x177   :  { %v1261_v29 = vunpack.c.h.s8.bf16 %v1217_v28  ;;  %v1260_v32 = vunpack.c.l.s8.bf16 %v1217_v28 }
 0x179   :  { %988 = vmatpush1.bf16.msra.mxu1 %v870_v30  ;;  %v1268_v30 = vunpack.c.l.s8.bf16 %v1221_v25 }
 0x17a   :  { %989 = vmatprep.subr.bf16.mxu1 %v863_v31  ;;  %v1220_v31 = vld [vmem:[%s2497_s6 + $0x70] sm:$0xff] }
 0x17d   :  { %990 = vmatpush1.bf16.msra.mxu1 %v862_v36  ;;  %v1267_v36 = vunpack.c.h.s8.bf16 %v1220_v31 }
 0x17e   :  { %1016 = vmatprep.subr.bf16.mxu1 %v921_v33  ;;  %v1216_v33 = vld [vmem:[%s2497_s6 + $0x50] sm:$0xff] }
 0x17f   :  { %v1259_v34 = vunpack.c.h.s8.bf16 %v1216_v33  ;;  %v1258_v38 = vunpack.c.l.s8.bf16 %v1216_v33 }
 0x180   :  { %1008 = vmatmul.mubr.bf16.vlgmr.msra.gmra.mxu1 %v2286_v13 }
 0x181   :  { %1017 = vmatpush1.bf16.msra.mxu1 %v920_v35  ;;  %1048 = vmatprep.mubr.bf16.mxu1 %v1844_v7  ;;  %v1266_v35 = vunpack.c.l.s8.bf16 %v1220_v31 }
 0x182   :  { %1018 = vmatprep.subr.bf16.mxu1 %v913_v37  ;;  %v1219_v37 = vld [vmem:[%s2497_s6 + $0x68] sm:$0xff] }
 0x185   :  { %1019 = vmatpush1.bf16.msra.mxu1 %v912_v39  ;;  %v1265_v39 = vunpack.c.h.s8.bf16 %v1219_v37 }
 0x186   :  { %1020 = vmatprep.subr.bf16.mxu1 %v905_v40  ;;  %v1215_v40 = vld [vmem:[%s2497_s6 + $0x48] sm:$0xff] }
 0x189   :  { %1021 = vmatpush1.bf16.msra.mxu1 %v904_v42  ;;  %v1257_v42 = vunpack.c.h.s8.bf16 %v1215_v40 }
 0x18a   :  { %1022 = vmatprep.subr.bf16.mxu1 %v897_v43  ;;  %v1264_v43 = vunpack.c.l.s8.bf16 %v1219_v37 }
 0x18d   :  { %1023 = vmatpush1.bf16.msra.mxu1 %v896_v45  ;;  %v1256_v45 = vunpack.c.l.s8.bf16 %v1215_v40 }
 0x18e   :  { %1024 = vmatprep.subr.bf16.mxu1 %v889_v46  ;;  %v1263_v46 = vunpack.c.h.s8.bf16 %v1218_v44 }
 0x191   :  { %1025 = vmatpush1.bf16.msra.mxu1 %v888_v48  ;;  %v1255_v48 = vunpack.c.h.s8.bf16 %v1214_v47 }
 0x192   :  { %1026 = vmatprep.subr.bf16.mxu1 %v881_v49  ;;  %v1262_v49 = vunpack.c.l.s8.bf16 %v1218_v44 }
 0x195   :  { %1027 = vmatpush1.bf16.msra.mxu1 %v880_v51  ;;  %v2400_v51 = vld [vmem:[%s2497_s6 + $0xf8] sm:$0xff] }
 0x196   :  { %1028 = vmatprep.subr.bf16.mxu1 %v873_v52  ;;  %v1301_v52 = vunpack.c.h.s8.bf16 %v2400_v51 }
 0x199   :  { %1029 = vmatpush1.bf16.msra.mxu1 %v872_v54  ;;  %v2403_v54 = vshrl.u32 %v1100_v53, 7 }
 0x19a   :  { %1030 = vmatprep.subr.bf16.mxu1 %v865_v55 }
 0x19b   :  { %v1102_v55 = vsub.s32 0, %v2403_v54  ;;  %v1110_v25 = vsub.s32 2, %v2403_v54  ;;  %v1114_v28 = vsub.s32 3, %v2403_v54 }
 0x19d   :  { %1031 = vmatpush1.bf16.msra.mxu1 %v864_v57  ;;  %v1106_v57 = vsub.s32 1, %v2403_v54  ;;  %v1103_v60 = vrot.slane %v2409_v56, %v1102_v55 }
 0x19e   :  { %1057 = vmatprep.subr.bf16.mxu1 %v923_v59  ;;  %v2415_v59 = vld [vmem:[%s2496_s5] sm:$0xff] }
 0x19f   :  { %v1157_v2 = vrot.slane %v2415_v59, %v1106_v57  ;;  %v1161_v33 = vrot.slane %v2415_v59, %v1110_v25 }
 0x1a0   :  { %1049 = vmatmul.mubr.bf16.vlgmr.msra.gmra.mxu1 %v2286_v13 }
 0x1a1   :  { %1058 = vmatpush1.bf16.msra.mxu1 %v922_v61  ;;  %1089 = vmatprep.mubr.bf16.mxu1 %v1844_v7  ;;  %v906_v7 = vunpack.c.h.s8.bf16 %v850_v5  ;;  %v1153_v61 = vrot.slane %v2415_v59, %v1102_v55  ;;  %v1300_v55 = vunpack.c.l.s8.bf16 %v2400_v51  ;;  %v1235_v51 = vld [vmem:[%s2497_s6 + $0xe8] sm:$0xff] }
 0x1a2   :  { %1059 = vmatprep.subr.bf16.mxu1 %v915_v63  ;;  %v1107_v63 = vrot.slane %v2409_v56, %v1106_v57  ;;  %v1236_v57 = vld [vmem:[%s2497_s6 + $0xf0] sm:$0xff] }
 0x1a5   :  { %1060 = vmatpush1.bf16.msra.mxu1 %v914_v3 }
 0x1a6   :  { %1061 = vmatprep.subr.bf16.mxu1 %v907_v4 }
 0x1a9   :  { %1062 = vmatpush1.bf16.msra.mxu1 %v906_v7  ;;  %v1225_v7 = vld [vmem:[%s2497_s6 + $0x98] sm:$0xff] }
 0x1aa   :  { %1063 = vmatprep.subr.bf16.mxu1 %v899_v10  ;;  %v1277_v12 = vunpack.c.h.s8.bf16 %v1225_v7  ;;  %v1276_v17 = vunpack.c.l.s8.bf16 %v1225_v7 }
 0x1ad   :  { %1064 = vmatpush1.bf16.msra.mxu1 %v898_v15 }
 0x1ae   :  { %1065 = vmatprep.subr.bf16.mxu1 %v891_v16  ;;  %v1228_v16 = vld [vmem:[%s2497_s6 + $0xb0] sm:$0xff] }
 0x1b1   :  { %1066 = vmatpush1.bf16.msra.mxu1 %v890_v18  ;;  %v1283_v18 = vunpack.c.h.s8.bf16 %v1228_v16 }
 0x1b2   :  { %1067 = vmatprep.subr.bf16.mxu1 %v883_v19  ;;  %v1224_v19 = vld [vmem:[%s2497_s6 + $0x90] sm:$0xff] }
 0x1b3   :  { %v1275_v62 = vunpack.c.h.s8.bf16 %v1224_v19  ;;  %v1274_v22 = vunpack.c.l.s8.bf16 %v1224_v19 }
 0x1b5   :  { %1068 = vmatpush1.bf16.msra.mxu1 %v882_v20  ;;  %v1282_v20 = vunpack.c.l.s8.bf16 %v1228_v16 }
 0x1b6   :  { %1069 = vmatprep.subr.bf16.mxu1 %v875_v21  ;;  %v1227_v21 = vld [vmem:[%s2497_s6 + $0xa8] sm:$0xff] }
 0x1b9   :  { %1070 = vmatpush1.bf16.msra.mxu1 %v874_v23  ;;  %v1281_v23 = vunpack.c.h.s8.bf16 %v1227_v21 }
 0x1ba   :  { %1071 = vmatprep.subr.bf16.mxu1 %v867_v24  ;;  %v1223_v24 = vld [vmem:[%s2497_s6 + $0x88] sm:$0xff] }
 0x1bb   :  { %v1272_v31 = vunpack.c.l.s8.bf16 %v1223_v24 }
 0x1bd   :  { %1072 = vmatpush1.bf16.msra.mxu1 %v866_v26  ;;  %v1273_v26 = vunpack.c.h.s8.bf16 %v1223_v24 }
 0x1be   :  { %1656 = vmatprep.subr.bf16.mxu1 %v1269_v27  ;;  %v1280_v27 = vunpack.c.l.s8.bf16 %v1227_v21 }
 0x1c0   :  { %1090 = vmatmul.mubr.bf16.vlgmr.msra.gmra.mxu1 %v2286_v13  ;;  %v1229_v13 = vld [vmem:[%s2497_s6 + $0xb8] sm:$0xff] }
 0x1c1   :  { %1657 = vmatpush3.bf16.msra.mxu1 %v1261_v29  ;;  %v1285_v41 = vunpack.c.h.s8.bf16 %v1229_v13  ;;  %v1284_v15 = vunpack.c.l.s8.bf16 %v1229_v13  ;;  %v1226_v29 = vld [vmem:[%s2497_s6 + $0xa0] sm:$0xff] }
 0x1c2   :  { %1658 = vmatprep.subr.bf16.mxu1 %v1268_v30  ;;  %v1111_v30 = vrot.slane %v2409_v56, %v1110_v25  ;;  %v1278_v40 = vunpack.c.l.s8.bf16 %v1226_v29 }
 0x1c3   :  { %1678 = vmatprep.subr.bf16.mxu0 %v1285_v41 }
 0x1c5   :  { %1659 = vmatpush3.bf16.msra.mxu1 %v1260_v32  ;;  %v1279_v32 = vunpack.c.h.s8.bf16 %v1226_v29 }
 0x1c6   :  { %1660 = vmatprep.subr.bf16.mxu1 %v1267_v36  ;;  %v1222_v36 = vld [vmem:[%s2497_s6 + $0x80] sm:$0xff] }
 0x1c7   :  { %v1271_v13 = vunpack.c.h.s8.bf16 %v1222_v36 }
 0x1c9   :  { %1661 = vmatpush3.bf16.msra.mxu1 %v1259_v34  ;;  %v1115_v34 = vrot.slane %v2409_v56, %v1114_v28 }
 0x1ca   :  { %1662 = vmatprep.subr.bf16.mxu1 %v1266_v35 }
 0x1cd   :  { %1663 = vmatpush3.bf16.msra.mxu1 %v1258_v38  ;;  %v1165_v38 = vrot.slane %v2415_v59, %v1114_v28 }
 0x1ce   :  { %1664 = vmatprep.subr.bf16.mxu1 %v1265_v39 }
 0x1d1   :  { %1665 = vmatpush3.bf16.msra.mxu1 %v1257_v42 }
 0x1d2   :  { %1666 = vmatprep.subr.bf16.mxu1 %v1264_v43 }
 0x1d5   :  { %1667 = vmatpush3.bf16.msra.mxu1 %v1256_v45  ;;  %v1270_v45 = vunpack.c.l.s8.bf16 %v1222_v36 }
 0x1d6   :  { %1668 = vmatprep.subr.bf16.mxu1 %v1263_v46 }
 0x1d9   :  { %1669 = vmatpush3.bf16.msra.mxu1 %v1255_v48  ;;  %v1233_v48 = vld [vmem:[%s2497_s6 + $0xd8] sm:$0xff] }
 0x1da   :  { %1670 = vmatprep.subr.bf16.mxu1 %v1262_v49 }
 0x1dd   :  { %1671 = vmatpush3.bf16.msra.mxu1 %v1254_v50 }
 0x1de   :  { %1700 = vmatprep.subr.bf16.mxu1 %v1301_v52  ;;  %v1293_v52 = vunpack.c.h.s8.bf16 %v1233_v48 }
 0x220   :  { %v968_v0 = vpop.f32.mrf.mxu1 }
 0x221   :  { %v1140_v1 = vmul.f32 %v1103_v60, %v968_v0  ;;  %v1292_v60 = vunpack.c.l.s8.bf16 %v1233_v48 }
 0x222   :  { %v970_v3 = vpop.f32.mrf.mxu1 }
 0x223   :  { %v1190_v4 = vadd.f32 %v1153_v61, %v1140_v1  ;;  %v1141_v5 = vmul.f32 %v1107_v63, %v970_v3  ;;  %v1299_v61 = vunpack.c.h.s8.bf16 %v1236_v57  ;;  %v1232_v63 = vld [vmem:[%s2497_s6 + $0xd0] sm:$0xff]  ;;  %v1298_v1 = vunpack.c.l.s8.bf16 %v1236_v57 }
 0x224   :  { %v972_v8 = vpop.f32.mrf.mxu1  ;;  %v1291_v0 = vunpack.c.h.s8.bf16 %v1232_v63  ;;  %v1297_v3 = vunpack.c.h.s8.bf16 %v1235_v51 }
 0x225   :  { %v1191_v6 = vadd.f32 %v1157_v2, %v1141_v5  ;;  %v1198_v58 = vmax.f32 %v1190_v4, 0.0  ;;  %v1290_v2 = vunpack.c.l.s8.bf16 %v1232_v63  ;;  %v1231_v4 = vld [vmem:[%s2497_s6 + $0xc8] sm:$0xff]  ;;  %v1118_v5 = vsub.s32 4, %v2403_v54 }
 0x226   :  { %v973_v9 = vpop.f32.mrf.mxu1  ;;  %v1289_v8 = vunpack.c.h.s8.bf16 %v1231_v4 }
 0x227   :  { %v1199_v10 = vmax.f32 %v1191_v6, 0.0  ;;  %v1302_v14 = vpack.c.bf16 %v1198_v58, %v1198_v58  ;;  %v1296_v6 = vunpack.c.l.s8.bf16 %v1235_v51  ;;  %v1122_v58 = vsub.s32 5, %v2403_v54  ;;  %v1234_v9 = vld [vmem:[%s2497_s6 + $0xe0] sm:$0xff] }
 0x228   :  { %v1119_v7 = vrot.slane %v2409_v56, %v1118_v5 }
 0x229   :  { %v1303_v11 = vpack.c.bf16 %v1199_v10, %v1199_v10  ;;  %v1288_v10 = vunpack.c.l.s8.bf16 %v1231_v4 }
 0x22b   :  { %1342 = vmatprep.mubr.bf16.mxu0 %v1303_v11  ;;  %v1295_v11 = vunpack.c.h.s8.bf16 %v1234_v9 }
 0x22c   :  { %1343 = vmatmul.mubr.bf16.vlgmr.msra.gmra.mxu0 %v1302_v14  ;;  %v1169_v14 = vrot.slane %v2415_v59, %v1118_v5 }
 0x22d   :  { %1679 = vmatpush3.bf16.msra.mxu0 %v1277_v12  ;;  %v1230_v12 = vld [vmem:[%s2497_s6 + $0xc0] sm:$0xff] }
 0x22e   :  { %1680 = vmatprep.subr.bf16.mxu0 %v1284_v15  ;;  %v1123_v15 = vrot.slane %v2409_v56, %v1122_v58  ;;  %v1287_v19 = vunpack.c.h.s8.bf16 %v1230_v12  ;;  %v1286_v25 = vunpack.c.l.s8.bf16 %v1230_v12 }
 0x231   :  { %1681 = vmatpush3.bf16.msra.mxu0 %v1276_v17 }
 0x232   :  { %1682 = vmatprep.subr.bf16.mxu0 %v1283_v18  ;;  %v1173_v18 = vrot.slane %v2415_v59, %v1122_v58 }
 0x235   :  { %1683 = vmatpush3.bf16.msra.mxu0 %v1275_v62 }
 0x236   :  { %1684 = vmatprep.subr.bf16.mxu0 %v1282_v20  ;;  %v1294_v20 = vunpack.c.l.s8.bf16 %v1234_v9 }
 0x239   :  { %1685 = vmatpush3.bf16.msra.mxu0 %v1274_v22 }
 0x23a   :  { %1686 = vmatprep.subr.bf16.mxu0 %v1281_v23 }
 0x23d   :  { %1687 = vmatpush3.bf16.msra.mxu0 %v1273_v26 }
 0x23e   :  { %1688 = vmatprep.subr.bf16.mxu0 %v1280_v27 }
 0x240   :  { %v1009_v35 = vpop.f32.mrf.mxu1 }
 0x241   :  { %v1142_v37 = vmul.f32 %v1111_v30, %v1009_v35  ;;  %1689 = vmatpush3.bf16.msra.mxu0 %v1272_v31  ;;  %v1126_v31 = vsub.s32 6, %v2403_v54 }
 0x242   :  { %v1011_v39 = vpop.f32.mrf.mxu1  ;;  %1690 = vmatprep.subr.bf16.mxu0 %v1279_v32  ;;  %v1130_v32 = vsub.s32 7, %v2403_v54 }
 0x243   :  { %v1192_v41 = vadd.f32 %v1161_v33, %v1142_v37  ;;  %v1143_v42 = vmul.f32 %v1115_v34, %v1011_v39  ;;  %v1127_v36 = vrot.slane %v2409_v56, %v1126_v31  ;;  %v1177_v33 = vrot.slane %v2415_v59, %v1126_v31 }
 0x244   :  { %v1013_v43 = vpop.f32.mrf.mxu1  ;;  %v1131_v34 = vrot.slane %v2409_v56, %v1130_v32 }
 0x245   :  { %v1193_v44 = vadd.f32 %v1165_v38, %v1143_v42  ;;  %1691 = vmatpush3.bf16.msra.mxu0 %v1271_v13  ;;  %v1200_v46 = vmax.f32 %v1192_v41, 0.0  ;;  %v1181_v38 = vrot.slane %v2415_v59, %v1130_v32 }
 0x246   :  { %v1014_v47 = vpop.f32.mrf.mxu1  ;;  %1692 = vmatprep.subr.bf16.mxu0 %v1278_v40 }
 0x247   :  { %v1201_v49 = vmax.f32 %v1193_v44, 0.0  ;;  %v1304_v53 = vpack.c.bf16 %v1200_v46, %v1200_v46 }
 0x249   :  { %v1305_v50 = vpack.c.bf16 %v1201_v49, %v1201_v49  ;;  %1693 = vmatpush3.bf16.msra.mxu0 %v1270_v45 }
 0x24b   :  { %1382 = vmatprep.mubr.bf16.mxu1 %v1305_v50 }
 0x24c   :  { %1383 = vmatmul.mubr.bf16.vlgmr.msra.gmra.mxu1 %v1304_v53 }
 0x24d   :  { %1701 = vmatpush3.bf16.msra.mxu1 %v1293_v52 }
 0x24e   :  { %1702 = vmatprep.subr.bf16.mxu1 %v1300_v55 }
 0x251   :  { %1703 = vmatpush3.bf16.msra.mxu1 %v1292_v60 }
 0x252   :  { %1704 = vmatprep.subr.bf16.mxu1 %v1299_v61 }
 0x255   :  { %1705 = vmatpush3.bf16.msra.mxu1 %v1291_v0 }
 0x256   :  { %1706 = vmatprep.subr.bf16.mxu1 %v1298_v1 }
 0x259   :  { %1707 = vmatpush3.bf16.msra.mxu1 %v1290_v2 }
 0x25a   :  { %1708 = vmatprep.subr.bf16.mxu1 %v1297_v3 }
 0x25d   :  { %1709 = vmatpush3.bf16.msra.mxu1 %v1289_v8 }
 0x25e   :  { %1710 = vmatprep.subr.bf16.mxu1 %v1296_v6  ;;  %v1567_v6 = vld [vmem:[%s2498_s7] ss:$0 sm:$0xff] }
 0x260   :  { %v1050_v16 = vpop.f32.mrf.mxu1 }
 0x261   :  { %v1144_v17 = vmul.f32 %v1119_v7, %v1050_v16  ;;  %1711 = vmatpush3.bf16.msra.mxu1 %v1288_v10  ;;  %v1568_v7 = vld [vmem:[%s2499_s8] ss:$0 sm:$0xff] }
 0x262   :  { %v1052_v62 = vpop.f32.mrf.mxu1  ;;  %1712 = vmatprep.subr.bf16.mxu1 %v1295_v11 }
 0x263   :  { %v1194_v21 = vadd.f32 %v1169_v14, %v1144_v17  ;;  %v1145_v22 = vmul.f32 %v1123_v15, %v1052_v62 }
 0x264   :  { %v1054_v23 = vpop.f32.mrf.mxu1 }
 0x265   :  { %v1195_v24 = vadd.f32 %v1173_v18, %v1145_v22  ;;  %1713 = vmatpush3.bf16.msra.mxu1 %v1287_v19  ;;  %v1202_v26 = vmax.f32 %v1194_v21, 0.0 }
 0x266   :  { %v1055_v27 = vpop.f32.mrf.mxu1  ;;  %1714 = vmatprep.subr.bf16.mxu1 %v1294_v20 }
 0x267   :  { %v1203_v28 = vmax.f32 %v1195_v24, 0.0  ;;  %v1306_v30 = vpack.c.bf16 %v1202_v26, %v1202_v26 }
 0x269   :  { %v1307_v29 = vpack.c.bf16 %v1203_v28, %v1203_v28  ;;  %1715 = vmatpush3.bf16.msra.mxu1 %v1286_v25 }
 0x26b   :  { %1422 = vmatprep.mubr.bf16.mxu0 %v1307_v29 }
 0x26c   :  { %1423 = vmatmul.mubr.bf16.vlgmr.msra.gmra.mxu0 %v1306_v30 }
 0x280   :  { %v1091_v35 = vpop.f32.mrf.mxu1 }
 0x281   :  { %v1146_v37 = vmul.f32 %v1127_v36, %v1091_v35 }
 0x282   :  { %v1093_v13 = vpop.f32.mrf.mxu1 }
 0x283   :  { %v1196_v39 = vadd.f32 %v1177_v33, %v1146_v37  ;;  %v1147_v40 = vmul.f32 %v1131_v34, %v1093_v13 }
 0x284   :  { %v1095_v41 = vpop.f32.mrf.mxu1 }
 0x285   :  { %v1197_v42 = vadd.f32 %v1181_v38, %v1147_v40  ;;  %v1204_v43 = vmax.f32 %v1196_v39, 0.0 }
 0x286   :  { %v1096_v44 = vpop.f32.mrf.mxu1 }
 0x287   :  { %v1205_v45 = vmax.f32 %v1197_v42, 0.0  ;;  %v1308_v54 = vpack.c.bf16 %v1204_v43, %v1204_v43 }
 0x289   :  { %v1309_v46 = vpack.c.bf16 %v1205_v45, %v1205_v45 }
 0x28b   :  { %1462 = vmatprep.mubr.bf16.mxu1 %v1309_v46 }
 0x28c   :  { %1463 = vmatmul.mubr.bf16.vlgmr.msra.gmra.mxu1 %v1308_v54 }
 0x2ec   :  { %v1650_v47 = vpop.f32.mrf.mxu0 }
 0x2ee   :  { %v1651_v48 = vpop.f32.mrf.mxu0 }
 0x2ef   :  { %v1652_v49 = vadd.f32 %v1651_v48, %v1650_v47 }
 0x2f0   :  { %v1653_v56 = vpop.f32.mrf.mxu0 }
 0x2f2   :  { %v1654_v50 = vpop.f32.mrf.mxu0 }
 0x30c   :  { %v1672_v52 = vpop.f32.mrf.mxu1 }
 0x30e   :  { %v1673_v53 = vpop.f32.mrf.mxu1 }
 0x30f   :  { %v1674_v0 = vadd.f32 %v1673_v53, %v1672_v52 }
 0x310   :  { %v1675_v59 = vpop.f32.mrf.mxu1 }
 0x311   :  { %v1385_v2 = vadd.f32 %v1674_v0, %v1652_v49 }
 0x312   :  { %v1676_v55 = vpop.f32.mrf.mxu1 }
 0x32c   :  { %v1694_v57 = vpop.f32.mrf.mxu0 }
 0x32e   :  { %v1695_v60 = vpop.f32.mrf.mxu0 }
 0x32f   :  { %v1696_v1 = vadd.f32 %v1695_v60, %v1694_v57 }
 0x330   :  { %v1697_v61 = vpop.f32.mrf.mxu0 }
 0x331   :  { %v1425_v4 = vadd.f32 %v1696_v1, %v1385_v2 }
 0x332   :  { %v1698_v63 = vpop.f32.mrf.mxu0 }
 0x34c   :  { %v1716_v51 = vpop.f32.mrf.mxu1 }
 0x34e   :  { %v1717_v3 = vpop.f32.mrf.mxu1 }
 0x34f   :  { %v1718_v5 = vadd.f32 %v1717_v3, %v1716_v51 }
 0x350   :  { %v1719_v8 = vpop.f32.mrf.mxu1 }
 0x351   :  { %v1465_v58 = vadd.f32 %v1718_v5, %v1425_v4 }
 0x352   :  { %v1720_v9 = vpop.f32.mrf.mxu1 }
 0x353   :  { %v1477_v10 = vmul.f32 %v1567_v6, %v1465_v58 }
 0x355   :  { %v1485_v11 = vadd.f32 %v1568_v7, %v1477_v10 }
 0x357   :  { %1486 = vst [vmem:[#allocation2] sm:$0x3] %v1485_v11 }
 0x358   :  { %1833 = shalt.err (!%p1830_p4)
}
 0x359   :  { %1496 = dma.vmem_to_hbm [thread:$0]  %s1494_s1, 32, %s2500_s9, [#allocation3]  }
 0x35a   :  { %1842 = dma.done.wait [#allocation3], 32  }
 0x35b   :  { %1843 = vsyncadd [#allocation3], 4294967264 }
 0x35c   :  { %1500 = vsyncpa [#allocation3], 1 }

</bundles_post_ra>
